<compile_context>
chip_gen: v5e
topology: v5e:2x2
jax: 0.10.0
libtpu: 0.0.40
codegen_flags: <defaults>
</compile_context>

<pallas_src>
import jax
import jax.numpy as jnp
from jax import lax
from jax.experimental import pallas as pl
from jax.experimental.pallas import tpu as pltpu

_EPS = 1e-07          # matches diffthermo's _eps
_R = 8.314            # gas constant used by the Gibbs free energy
_N_OMEGA = 4          # number of Redlich-Kister interaction parameters
_ROWS = 2             # row 0 = x_alpha, row 1 = x_beta
_LANES = 128          # independent problems per grid block (one per lane)

_INNER_TOL = 1e-6     # Newton |dx| tolerance (PyTorch: 1e-06)
_OUTER_TOL = 1e-4     # common-tangent tolerance (PyTorch: 0.0001)
_MAX_ITER = 300       # iteration cap for both loops (PyTorch: 300)
_UNROLL = 4           # Newton steps per while_loop trip (300 % 4 == 0 -> exact cap)


def _recip(v):
    """1/v: EUP approx reciprocal + one VPU Newton refinement (near-exact, free filler)."""
    r = pl.reciprocal(v, approx=True)
    return r * (2.0 - v * r)


def _fixed_point_kernel(x_ref, p_ref, out_ref):
    one = jnp.float32(1.0)

    # Per-lane parameters, each a (1, LANES) vector broadcast over both rows.
    omegas = [p_ref[pl.ds(i, 1), :] for i in range(_N_OMEGA)]
    g0 = p_ref[pl.ds(_N_OMEGA, 1), :]
    rt = p_ref[pl.ds(_N_OMEGA + 1, 1), :]          # R*T, precomputed on host

    # +1 on the alpha row, -1 on the beta row: forms per-lane differences
    # (G(xa)-G(xb), xa-xb) with a sublane reduction instead of row slicing.
    row = lax.broadcasted_iota(jnp.int32, (_ROWS, _LANES), 0)
    sign = jnp.where(row == 0, 1.0, -1.0).astype(jnp.float32)

    def g_only(x):
        """G(x) (outer-loop path).  Both logs packed into ONE EUP push."""
        t = one - 2.0 * x
        xp = x * (one - x)
        logs = jnp.log(jnp.concatenate([x, one - x], axis=0))    # (4, L): single push
        lx, l1mx = logs[:_ROWS, :], logs[_ROWS:, :]
        g = x * g0 + rt * (x * lx + (one - x) * l1mx)
        tp = jnp.ones_like(x)
        for i in range(_N_OMEGA):
            g = g + omegas[i] * (xp * tp)
            tp = tp * t
        return g

    def mu_dmu(x):
        """dG/dx and d2G/dx2 (closed form of what autograd computes), inner path.
        Only ONE log per Newton step: RT*(ln x - ln(1-x)) == RT*ln(x/(1-x))."""
        t = one - 2.0 * x
        xp = x * (one - x)
        tp = [jnp.ones_like(x)]
        for _ in range(_N_OMEGA):
            tp.append(tp[-1] * t)
        dg = g0 + rt * jnp.log(x / (one - x))
        d2g = rt * _recip(xp)                  # RT*(1/x + 1/(1-x)) == RT/(x(1-x))
        for i in range(_N_OMEGA):
            # d/dx [x(1-x) t^i]  = t^(i+1) - 2 i x(1-x) t^(i-1)
            dterm = tp[i + 1]
            if i >= 1:
                dterm = dterm - (2.0 * i) * (xp * tp[i - 1])
            dg = dg + omegas[i] * dterm
            # d2/dx2 [x(1-x) t^i] = -2(2i+1) t^i + 4 i(i-1) x(1-x) t^(i-2)
            d2term = (-2.0 * (2 * i + 1)) * tp[i]
            if i >= 2:
                d2term = d2term + (4.0 * i * (i - 1)) * (xp * tp[i - 2])
            d2g = d2g + omegas[i] * d2term
        return dg, d2g

    def common_tangent(x):
        """ct = (G(xa) - G(xb)) / (xa - xb) per lane, shape (1, L).
        No guard on xa == xb, matching the PyTorch reference (inf/nan propagates)."""
        g = g_only(x)
        num = jnp.sum(sign * g, axis=0, keepdims=True)
        den = jnp.sum(sign * x, axis=0, keepdims=True)
        return num / den

    def any_above(v, tol):
        """f32 scalar: 1.0 if any element has |v| > tol (NaN counts as converged,
        matching PyTorch's while-condition semantics)."""
        return jnp.max(jnp.where(jnp.abs(v) > tol, 1.0, 0.0).astype(jnp.float32))

    def newton(x0, ct, root_active):
        """Fused Newton-Raphson on f(x) = dG/dx - ct for all roots and lanes.
        Per-element masking freezes each root once its own |dx| <= 1e-6, so each
        root's iterate sequence is identical to solving it alone (the two PyTorch
        per-root while loops).  Body unrolled _UNROLL x so the XLU reduce +
        scalar branch is paid once per block, not once per step."""
        dx0 = jnp.where(root_active > 0.5, jnp.float32(999999.0), jnp.float32(0.0))

        def one_step(x, dx):
            active = jnp.abs(dx) > _INNER_TOL
            mu, dmu = mu_dmu(x)
            # Convergence tested on the raw (pre-clamp) step, as in the reference.
            dx_new = -(mu - ct) * _recip(dmu)
            x_new = jnp.clip(x + dx_new, jnp.float32(_EPS), jnp.float32(1.0 - _EPS))
            return jnp.where(active, x_new, x), jnp.where(active, dx_new, dx)

        def cond(carry):
            _, _, flag, n = carry
            return jnp.logical_and(flag > 0.5, n < _MAX_ITER)

        def body(carry):
            x, dx, _, n = carry
            for _ in range(_UNROLL):          # trace-time unroll
                x, dx = one_step(x, dx)
            return x, dx, any_above(dx, _INNER_TOL), n + _UNROLL

        init = (x0, dx0, any_above(dx0, _INNER_TOL), jnp.int32(0))
        x, _, _, _ = lax.while_loop(cond, body, init)
        return x

    # ---- outer common-tangent fixed point ---------------------------------
    x_state = x_ref[...]                        # (2, L): row 0 alpha, row 1 beta
    ct0 = common_tangent(x_state)
    act0 = jnp.ones((1, _LANES), jnp.float32)   # per-lane "still iterating" flag

    def outer_cond(carry):
        _, _, act, n = carry
        return jnp.logical_and(jnp.max(act) > 0.5, n < _MAX_ITER)

    def outer_body(carry):
        x, ct, act, n = carry
        # Lanes whose dct already converged are frozen (dx0 = 0 inside newton),
        # so their x / ct stay identical -> exact parity with per-problem stop.
        root_active = jnp.broadcast_to(act, x.shape)
        x_new = newton(x, ct, root_active)
        ct_new = common_tangent(x_new)
        dct = jnp.abs(ct_new - ct)
        act_new = jnp.where(jnp.logical_and(act > 0.5, dct > _OUTER_TOL),
                            1.0, 0.0).astype(jnp.float32)
        return x_new, ct_new, act_new, n + 1

    x_state, _, _, _ = lax.while_loop(
        outer_cond, outer_body, (x_state, ct0, act0, jnp.int32(0)))

    out_ref[...] = x_state


def fixed_point_forward_batched(x0, omegas, g0, T=300.0):
    """Solve B independent common-tangent problems (one per lane).
    x0: (B, 2) [x_alpha_init, x_beta_init]; omegas: (B, 4); g0: (B,) or scalar;
    T: scalar or (B,).  Returns (B, 2) [x_alpha, x_beta]."""
    x0 = jnp.asarray(x0, jnp.float32)
    B = x0.shape[0]
    om = jnp.asarray(omegas, jnp.float32).reshape(B, _N_OMEGA)
    g0v = jnp.broadcast_to(jnp.asarray(g0, jnp.float32).reshape(-1), (B,))
    tv = jnp.broadcast_to(jnp.asarray(T, jnp.float32).reshape(-1), (B,))

    # lane-major layouts: x (2, B); params (6, B) = [Omega0..3, G0, R*T]
    x_l = x0.T
    params = jnp.concatenate(
        [om.T, g0v.reshape(1, B), (_R * tv).reshape(1, B)], axis=0)

    nblk = -(-B // _LANES)
    pad = nblk * _LANES - B
    if pad:
        # replicate the last problem into the padding lanes (dropped from output)
        x_l = jnp.pad(x_l, ((0, 0), (0, pad)), mode="edge")
        params = jnp.pad(params, ((0, 0), (0, pad)), mode="edge")

    out = pl.pallas_call(
        _fixed_point_kernel,
        out_shape=jax.ShapeDtypeStruct((_ROWS, nblk * _LANES), jnp.float32),
        grid=(nblk,),
        in_specs=[
            pl.BlockSpec((_ROWS, _LANES), lambda i: (0, i)),
            pl.BlockSpec((_N_OMEGA + 2, _LANES), lambda i: (0, i)),
        ],
        out_specs=pl.BlockSpec((_ROWS, _LANES), lambda i: (0, i)),
        compiler_params=pltpu.CompilerParams(
            dimension_semantics=("parallel",)),   # shards blocks over v7x's 2 TCs
    )(x_l, params)
    return out[:, :B].T


def fixed_point_forward(x, omegas, g0, T=300.0):
    """Module-equivalent single-problem API: x (2,) -> (2,) [x_alpha, x_beta]."""
    out = fixed_point_forward_batched(
        jnp.reshape(jnp.asarray(x, jnp.float32), (1, 2)),
        jnp.reshape(jnp.asarray(omegas, jnp.float32), (1, _N_OMEGA)),
        jnp.reshape(jnp.asarray(g0, jnp.float32), (1,)), T)
    return out[0]


if __name__ == "__main__":
    key = jax.random.PRNGKey(0)
    B = 8                                   # small batch of independent RK systems
    k1, k2, k3, k4 = jax.random.split(key, 4)

    # initial guesses for the left / right limits of the phase-coexistence region
    xa0 = jax.random.uniform(k1, (B,), jnp.float32, minval=0.05, maxval=0.12)
    xb0 = jax.random.uniform(k2, (B,), jnp.float32, minval=0.88, maxval=0.95)
    x0 = jnp.stack([xa0, xb0], axis=1)      # (B, 2)

    # deterministic synthetic RK parameters around [8000, -1000, 500, 200], G0
    base = jnp.array([8000.0, -1000.0, 500.0, 200.0], jnp.float32)
    scale = 1.0 + 0.05 * jax.random.normal(k3, (B, _N_OMEGA), jnp.float32)
    omegas = base[None, :] * scale          # (B, 4)
    g0 = -5000.0 + 500.0 * jax.random.normal(k4, (B,), jnp.float32)
    T = 300.0

    out = fixed_point_forward_batched(x0, omegas, g0, T)
    out = jax.block_until_ready(out)

    assert out.shape == (B, 2)
    assert bool(jnp.all(jnp.isfinite(out))), "non-finite result"
    assert bool(jnp.all((out > 0.0) & (out < 1.0))), "roots out of range"
    assert bool(jnp.all(out[:, 0] < out[:, 1])), "x_alpha should be left of x_beta"
    print("KERNEL_OK")
</pallas_src>

<mosaic_0001>
module attributes {stable_mosaic.version = 11 : i64} {
  func.func @_fixed_point_kernel(%arg0: i32, %arg1: memref<2x128xf32, #tpu.memory_space<vmem>>, %arg2: memref<6x128xf32, #tpu.memory_space<vmem>>, %arg3: memref<2x128xf32, #tpu.memory_space<vmem>>) attributes {dimension_semantics = [#tpu.dimension_semantics<parallel>], iteration_bounds = array<i64: 1>, scalar_prefetch = 0 : i64, scratch_operands = 0 : i64, tpu.core_type = #tpu.core_type<tc>, window_params = [{transform_indices = @transform_0, window_bounds = array<i64: 2, 128>}, {transform_indices = @transform_1, window_bounds = array<i64: 6, 128>}, {transform_indices = @transform_2, window_bounds = array<i64: 2, 128>}]} {
    %c0 = arith.constant 0 : index
    %c0_0 = arith.constant 0 : index
    %0 = vector.load %arg2[%c0, %c0_0] : memref<6x128xf32, #tpu.memory_space<vmem>>, vector<1x128xf32>
    %c1 = arith.constant 1 : index
    %c0_1 = arith.constant 0 : index
    %1 = vector.load %arg2[%c1, %c0_1] : memref<6x128xf32, #tpu.memory_space<vmem>>, vector<1x128xf32>
    %c2 = arith.constant 2 : index
    %c0_2 = arith.constant 0 : index
    %2 = vector.load %arg2[%c2, %c0_2] : memref<6x128xf32, #tpu.memory_space<vmem>>, vector<1x128xf32>
    %c3 = arith.constant 3 : index
    %c0_3 = arith.constant 0 : index
    %3 = vector.load %arg2[%c3, %c0_3] : memref<6x128xf32, #tpu.memory_space<vmem>>, vector<1x128xf32>
    %c4 = arith.constant 4 : index
    %c0_4 = arith.constant 0 : index
    %4 = vector.load %arg2[%c4, %c0_4] : memref<6x128xf32, #tpu.memory_space<vmem>>, vector<1x128xf32>
    %c5 = arith.constant 5 : index
    %c0_5 = arith.constant 0 : index
    %5 = vector.load %arg2[%c5, %c0_5] : memref<6x128xf32, #tpu.memory_space<vmem>>, vector<1x128xf32>
    %6 = tpu.iota {dimensions = array<i32: 0>} : vector<2x128xi32>
    %c0_i32 = arith.constant 0 : i32
    %7 = vector.broadcast %c0_i32 : i32 to vector<2x128xi32>
    %8 = arith.cmpi eq, %6, %7 : vector<2x128xi32>
    %cst = arith.constant 1.000000e+00 : f32
    %cst_6 = arith.constant -1.000000e+00 : f32
    %9 = vector.broadcast %cst : f32 to vector<2x128xf32>
    %10 = vector.broadcast %cst_6 : f32 to vector<2x128xf32>
    %11 = arith.select %8, %9, %10 : vector<2x128xi1>, vector<2x128xf32>
    %c0_7 = arith.constant 0 : index
    %c0_8 = arith.constant 0 : index
    %12 = vector.load %arg1[%c0_7, %c0_8] : memref<2x128xf32, #tpu.memory_space<vmem>>, vector<2x128xf32>
    %cst_9 = arith.constant 2.000000e+00 : f32
    %13 = vector.broadcast %cst_9 : f32 to vector<2x128xf32>
    %14 = arith.mulf %13, %12 : vector<2x128xf32>
    %cst_10 = arith.constant 1.000000e+00 : f32
    %15 = vector.broadcast %cst_10 : f32 to vector<2x128xf32>
    %16 = arith.subf %15, %14 : vector<2x128xf32>
    %cst_11 = arith.constant 1.000000e+00 : f32
    %17 = vector.broadcast %cst_11 : f32 to vector<2x128xf32>
    %18 = arith.subf %17, %12 : vector<2x128xf32>
    %19 = arith.mulf %12, %18 : vector<2x128xf32>
    %cst_12 = arith.constant 1.000000e+00 : f32
    %20 = vector.broadcast %cst_12 : f32 to vector<2x128xf32>
    %21 = arith.subf %20, %12 : vector<2x128xf32>
    %22 = tpu.concatenate %12, %21 in 0 : vector<2x128xf32>, vector<2x128xf32> -> vector<4x128xf32>
    %23 = math.log %22 : vector<4x128xf32>
    %24 = vector.extract_strided_slice %23 {offsets = [0, 0], sizes = [2, 128], strides = [1, 1]} : vector<4x128xf32> to vector<2x128xf32>
    %25 = vector.extract_strided_slice %23 {offsets = [2, 0], sizes = [2, 128], strides = [1, 1]} : vector<4x128xf32> to vector<2x128xf32>
    %26 = vector.broadcast %4 : vector<1x128xf32> to vector<2x128xf32>
    %27 = arith.mulf %12, %26 : vector<2x128xf32>
    %28 = arith.mulf %12, %24 : vector<2x128xf32>
    %cst_13 = arith.constant 1.000000e+00 : f32
    %29 = vector.broadcast %cst_13 : f32 to vector<2x128xf32>
    %30 = arith.subf %29, %12 : vector<2x128xf32>
    %31 = arith.mulf %30, %25 : vector<2x128xf32>
    %32 = arith.addf %28, %31 : vector<2x128xf32>
    %33 = vector.broadcast %5 : vector<1x128xf32> to vector<2x128xf32>
    %34 = arith.mulf %33, %32 : vector<2x128xf32>
    %35 = arith.addf %27, %34 : vector<2x128xf32>
    %cst_14 = arith.constant 1.000000e+00 : f32
    %36 = vector.broadcast %cst_14 : f32 to vector<2x128xf32>
    %37 = arith.mulf %19, %36 : vector<2x128xf32>
    %38 = vector.broadcast %0 : vector<1x128xf32> to vector<2x128xf32>
    %39 = arith.mulf %38, %37 : vector<2x128xf32>
    %40 = arith.addf %35, %39 : vector<2x128xf32>
    %41 = arith.mulf %36, %16 : vector<2x128xf32>
    %42 = arith.mulf %19, %41 : vector<2x128xf32>
    %43 = vector.broadcast %1 : vector<1x128xf32> to vector<2x128xf32>
    %44 = arith.mulf %43, %42 : vector<2x128xf32>
    %45 = arith.addf %40, %44 : vector<2x128xf32>
    %46 = arith.mulf %41, %16 : vector<2x128xf32>
    %47 = arith.mulf %19, %46 : vector<2x128xf32>
    %48 = vector.broadcast %2 : vector<1x128xf32> to vector<2x128xf32>
    %49 = arith.mulf %48, %47 : vector<2x128xf32>
    %50 = arith.addf %45, %49 : vector<2x128xf32>
    %51 = arith.mulf %46, %16 : vector<2x128xf32>
    %52 = arith.mulf %19, %51 : vector<2x128xf32>
    %53 = vector.broadcast %3 : vector<1x128xf32> to vector<2x128xf32>
    %54 = arith.mulf %53, %52 : vector<2x128xf32>
    %55 = arith.addf %50, %54 : vector<2x128xf32>
    %56 = arith.mulf %11, %55 : vector<2x128xf32>
    %cst_15 = arith.constant dense<0.000000e+00> : vector<128xf32>
    %57 = vector.multi_reduction <add>, %56, %cst_15 [0] : vector<2x128xf32> to vector<128xf32>
    %58 = vector.shape_cast %57 : vector<128xf32> to vector<1x128xf32>
    %59 = arith.mulf %11, %12 : vector<2x128xf32>
    %cst_16 = arith.constant dense<0.000000e+00> : vector<128xf32>
    %60 = vector.multi_reduction <add>, %59, %cst_16 [0] : vector<2x128xf32> to vector<128xf32>
    %61 = vector.shape_cast %60 : vector<128xf32> to vector<1x128xf32>
    %62 = arith.divf %58, %61 : vector<1x128xf32>
    %cst_17 = arith.constant 1.000000e+00 : f32
    %63 = vector.broadcast %cst_17 : f32 to vector<1x128xf32>
    %cst_18 = arith.constant 1.000000e+00 : f32
    %c0_i32_19 = arith.constant 0 : i32
    %64:4 = scf.while (%arg4 = %12, %arg5 = %62, %arg6 = %63, %arg7 = %c0_i32_19) : (vector<2x128xf32>, vector<1x128xf32>, vector<1x128xf32>, i32) -> (vector<2x128xf32>, vector<1x128xf32>, vector<1x128xf32>, i32) {
      %66 = vector.shape_cast %arg6 : vector<1x128xf32> to vector<1x1x128xf32>
      %cst_22 = arith.constant dense<0xFF800000> : vector<1xf32>
      %67 = vector.multi_reduction <maximumf>, %66, %cst_22 [1, 2] : vector<1x1x128xf32> to vector<1xf32>
      %68 = vector.shape_cast %67 : vector<1xf32> to vector<1x1x1xf32>
      %69 = vector.extract %68[0, 0, 0] : f32 from vector<1x1x1xf32>
      %cst_23 = arith.constant 5.000000e-01 : f32
      %70 = arith.cmpf ogt, %69, %cst_23 : f32
      %c300_i32 = arith.constant 300 : i32
      %71 = arith.cmpi slt, %arg7, %c300_i32 : i32
      %72 = arith.andi %70, %71 : i1
      scf.condition(%72) %arg4, %arg5, %arg6, %arg7 : vector<2x128xf32>, vector<1x128xf32>, vector<1x128xf32>, i32
    } do {
    ^bb0(%arg4: vector<2x128xf32>, %arg5: vector<1x128xf32>, %arg6: vector<1x128xf32>, %arg7: i32):
      %66 = vector.shape_cast %arg6 : vector<1x128xf32> to vector<1x128xf32>
      %67 = vector.broadcast %66 : vector<1x128xf32> to vector<2x128xf32>
      %cst_22 = arith.constant 5.000000e-01 : f32
      %68 = vector.broadcast %cst_22 : f32 to vector<2x128xf32>
      %69 = arith.cmpf ogt, %67, %68 : vector<2x128xf32>
      %cst_23 = arith.constant 9.999990e+05 : f32
      %cst_24 = arith.constant 0.000000e+00 : f32
      %70 = vector.broadcast %cst_23 : f32 to vector<2x128xf32>
      %71 = vector.broadcast %cst_24 : f32 to vector<2x128xf32>
      %72 = arith.select %69, %70, %71 : vector<2x128xi1>, vector<2x128xf32>
      %73 = math.absf %72 : vector<2x128xf32>
      %cst_25 = arith.constant 9.99999997E-7 : f32
      %74 = vector.broadcast %cst_25 : f32 to vector<2x128xf32>
      %75 = arith.cmpf ogt, %73, %74 : vector<2x128xf32>
      %cst_26 = arith.constant 1.000000e+00 : f32
      %cst_27 = arith.constant 0.000000e+00 : f32
      %76 = vector.broadcast %cst_26 : f32 to vector<2x128xf32>
      %77 = vector.broadcast %cst_27 : f32 to vector<2x128xf32>
      %78 = arith.select %75, %76, %77 : vector<2x128xi1>, vector<2x128xf32>
      %79 = vector.shape_cast %78 : vector<2x128xf32> to vector<1x2x128xf32>
      %cst_28 = arith.constant dense<0xFF800000> : vector<1xf32>
      %80 = vector.multi_reduction <maximumf>, %79, %cst_28 [1, 2] : vector<1x2x128xf32> to vector<1xf32>
      %81 = vector.shape_cast %80 : vector<1xf32> to vector<1x1x1xf32>
      %82 = vector.extract %81[0, 0, 0] : f32 from vector<1x1x1xf32>
      %c0_i32_29 = arith.constant 0 : i32
      %83:4 = scf.while (%arg8 = %arg4, %arg9 = %72, %arg10 = %82, %arg11 = %c0_i32_29) : (vector<2x128xf32>, vector<2x128xf32>, f32, i32) -> (vector<2x128xf32>, vector<2x128xf32>, f32, i32) {
        %cst_38 = arith.constant 5.000000e-01 : f32
        %146 = arith.cmpf ogt, %arg10, %cst_38 : f32
        %c300_i32 = arith.constant 300 : i32
        %147 = arith.cmpi slt, %arg11, %c300_i32 : i32
        %148 = arith.andi %146, %147 : i1
        scf.condition(%148) %arg8, %arg9, %arg10, %arg11 : vector<2x128xf32>, vector<2x128xf32>, f32, i32
      } do {
      ^bb0(%arg8: vector<2x128xf32>, %arg9: vector<2x128xf32>, %arg10: f32, %arg11: i32):
        %146 = math.absf %arg9 : vector<2x128xf32>
        %cst_38 = arith.constant 9.99999997E-7 : f32
        %147 = vector.broadcast %cst_38 : f32 to vector<2x128xf32>
        %148 = arith.cmpf ogt, %146, %147 : vector<2x128xf32>
        %cst_39 = arith.constant 2.000000e+00 : f32
        %149 = vector.broadcast %cst_39 : f32 to vector<2x128xf32>
        %150 = arith.mulf %149, %arg8 : vector<2x128xf32>
        %151 = vector.broadcast %cst_18 : f32 to vector<2x128xf32>
        %152 = arith.subf %151, %150 : vector<2x128xf32>
        %153 = vector.broadcast %cst_18 : f32 to vector<2x128xf32>
        %154 = arith.subf %153, %arg8 : vector<2x128xf32>
        %155 = arith.mulf %arg8, %154 : vector<2x128xf32>
        %cst_40 = arith.constant 1.000000e+00 : f32
        %156 = vector.broadcast %cst_40 : f32 to vector<2x128xf32>
        %157 = arith.mulf %156, %152 : vector<2x128xf32>
        %158 = arith.mulf %157, %152 : vector<2x128xf32>
        %159 = arith.mulf %158, %152 : vector<2x128xf32>
        %160 = arith.mulf %159, %152 : vector<2x128xf32>
        %161 = vector.broadcast %cst_18 : f32 to vector<2x128xf32>
        %162 = arith.subf %161, %arg8 : vector<2x128xf32>
        %163 = arith.divf %arg8, %162 : vector<2x128xf32>
        %164 = math.log %163 : vector<2x128xf32>
        %165 = vector.broadcast %5 : vector<1x128xf32> to vector<2x128xf32>
        %166 = arith.mulf %165, %164 : vector<2x128xf32>
        %167 = vector.broadcast %4 : vector<1x128xf32> to vector<2x128xf32>
        %168 = arith.addf %167, %166 : vector<2x128xf32>
        %169 = tpu.reciprocal %155 {approx = true} : vector<2x128xf32> -> vector<2x128xf32>
        %170 = arith.mulf %155, %169 : vector<2x128xf32>
        %cst_41 = arith.constant 2.000000e+00 : f32
        %171 = vector.broadcast %cst_41 : f32 to vector<2x128xf32>
        %172 = arith.subf %171, %170 : vector<2x128xf32>
        %173 = arith.mulf %169, %172 : vector<2x128xf32>
        %174 = vector.broadcast %5 : vector<1x128xf32> to vector<2x128xf32>
        %175 = arith.mulf %174, %173 : vector<2x128xf32>
        %176 = vector.broadcast %0 : vector<1x128xf32> to vector<2x128xf32>
        %177 = arith.mulf %176, %157 : vector<2x128xf32>
        %178 = arith.addf %168, %177 : vector<2x128xf32>
        %cst_42 = arith.constant -2.000000e+00 : f32
        %179 = vector.broadcast %cst_42 : f32 to vector<2x128xf32>
        %180 = arith.mulf %179, %156 : vector<2x128xf32>
        %181 = vector.broadcast %0 : vector<1x128xf32> to vector<2x128xf32>
        %182 = arith.mulf %181, %180 : vector<2x128xf32>
        %183 = arith.addf %175, %182 : vector<2x128xf32>
        %184 = arith.mulf %155, %156 : vector<2x128xf32>
        %cst_43 = arith.constant 2.000000e+00 : f32
        %185 = vector.broadcast %cst_43 : f32 to vector<2x128xf32>
        %186 = arith.mulf %185, %184 : vector<2x128xf32>
        %187 = arith.subf %158, %186 : vector<2x128xf32>
        %188 = vector.broadcast %1 : vector<1x128xf32> to vector<2x128xf32>
        %189 = arith.mulf %188, %187 : vector<2x128xf32>
        %190 = arith.addf %178, %189 : vector<2x128xf32>
        %cst_44 = arith.constant -6.000000e+00 : f32
        %191 = vector.broadcast %cst_44 : f32 to vector<2x128xf32>
        %192 = arith.mulf %191, %157 : vector<2x128xf32>
        %193 = vector.broadcast %1 : vector<1x128xf32> to vector<2x128xf32>
        %194 = arith.mulf %193, %192 : vector<2x128xf32>
        %195 = arith.addf %183, %194 : vector<2x128xf32>
        %196 = arith.mulf %155, %157 : vector<2x128xf32>
        %cst_45 = arith.constant 4.000000e+00 : f32
        %197 = vector.broadcast %cst_45 : f32 to vector<2x128xf32>
        %198 = arith.mulf %197, %196 : vector<2x128xf32>
        %199 = arith.subf %159, %198 : vector<2x128xf32>
        %200 = vector.broadcast %2 : vector<1x128xf32> to vector<2x128xf32>
        %201 = arith.mulf %200, %199 : vector<2x128xf32>
        %202 = arith.addf %190, %201 : vector<2x128xf32>
        %cst_46 = arith.constant -1.000000e+01 : f32
        %203 = vector.broadcast %cst_46 : f32 to vector<2x128xf32>
        %204 = arith.mulf %203, %158 : vector<2x128xf32>
        %205 = arith.mulf %155, %156 : vector<2x128xf32>
        %cst_47 = arith.constant 8.000000e+00 : f32
        %206 = vector.broadcast %cst_47 : f32 to vector<2x128xf32>
        %207 = arith.mulf %206, %205 : vector<2x128xf32>
        %208 = arith.addf %204, %207 : vector<2x128xf32>
        %209 = vector.broadcast %2 : vector<1x128xf32> to vector<2x128xf32>
        %210 = arith.mulf %209, %208 : vector<2x128xf32>
        %211 = arith.addf %195, %210 : vector<2x128xf32>
        %212 = arith.mulf %155, %158 : vector<2x128xf32>
        %cst_48 = arith.constant 6.000000e+00 : f32
        %213 = vector.broadcast %cst_48 : f32 to vector<2x128xf32>
        %214 = arith.mulf %213, %212 : vector<2x128xf32>
        %215 = arith.subf %160, %214 : vector<2x128xf32>
        %216 = vector.broadcast %3 : vector<1x128xf32> to vector<2x128xf32>
        %217 = arith.mulf %216, %215 : vector<2x128xf32>
        %218 = arith.addf %202, %217 : vector<2x128xf32>
        %cst_49 = arith.constant -1.400000e+01 : f32
        %219 = vector.broadcast %cst_49 : f32 to vector<2x128xf32>
        %220 = arith.mulf %219, %159 : vector<2x128xf32>
        %221 = arith.mulf %155, %157 : vector<2x128xf32>
        %cst_50 = arith.constant 2.400000e+01 : f32
        %222 = vector.broadcast %cst_50 : f32 to vector<2x128xf32>
        %223 = arith.mulf %222, %221 : vector<2x128xf32>
        %224 = arith.addf %220, %223 : vector<2x128xf32>
        %225 = vector.broadcast %3 : vector<1x128xf32> to vector<2x128xf32>
        %226 = arith.mulf %225, %224 : vector<2x128xf32>
        %227 = arith.addf %211, %226 : vector<2x128xf32>
        %228 = vector.broadcast %arg5 : vector<1x128xf32> to vector<2x128xf32>
        %229 = arith.subf %218, %228 : vector<2x128xf32>
        %cst_51 = arith.constant 0.000000e+00 : f32
        %230 = vector.broadcast %cst_51 : f32 to vector<2x128xf32>
        %231 = arith.subf %230, %229 : vector<2x128xf32>
        %232 = tpu.reciprocal %227 {approx = true} : vector<2x128xf32> -> vector<2x128xf32>
        %233 = arith.mulf %227, %232 : vector<2x128xf32>
        %cst_52 = arith.constant 2.000000e+00 : f32
        %234 = vector.broadcast %cst_52 : f32 to vector<2x128xf32>
        %235 = arith.subf %234, %233 : vector<2x128xf32>
        %236 = arith.mulf %232, %235 : vector<2x128xf32>
        %237 = arith.mulf %231, %236 : vector<2x128xf32>
        %238 = arith.addf %arg8, %237 : vector<2x128xf32>
        %cst_53 = arith.constant 1.000000e-07 : f32
        %cst_54 = arith.constant 0.99999988 : f32
        %239 = vector.broadcast %cst_53 : f32 to vector<2x128xf32>
        %240 = arith.maximumf %239, %238 : vector<2x128xf32>
        %241 = vector.broadcast %cst_54 : f32 to vector<2x128xf32>
        %242 = arith.minimumf %241, %240 : vector<2x128xf32>
        %243 = arith.select %148, %242, %arg8 : vector<2x128xi1>, vector<2x128xf32>
        %244 = arith.select %148, %237, %arg9 : vector<2x128xi1>, vector<2x128xf32>
        %245 = math.absf %244 : vector<2x128xf32>
        %cst_55 = arith.constant 9.99999997E-7 : f32
        %246 = vector.broadcast %cst_55 : f32 to vector<2x128xf32>
        %247 = arith.cmpf ogt, %245, %246 : vector<2x128xf32>
        %cst_56 = arith.constant 2.000000e+00 : f32
        %248 = vector.broadcast %cst_56 : f32 to vector<2x128xf32>
        %249 = arith.mulf %248, %243 : vector<2x128xf32>
        %250 = vector.broadcast %cst_18 : f32 to vector<2x128xf32>
        %251 = arith.subf %250, %249 : vector<2x128xf32>
        %252 = vector.broadcast %cst_18 : f32 to vector<2x128xf32>
        %253 = arith.subf %252, %243 : vector<2x128xf32>
        %254 = arith.mulf %243, %253 : vector<2x128xf32>
        %cst_57 = arith.constant 1.000000e+00 : f32
        %255 = vector.broadcast %cst_57 : f32 to vector<2x128xf32>
        %256 = arith.mulf %255, %251 : vector<2x128xf32>
        %257 = arith.mulf %256, %251 : vector<2x128xf32>
        %258 = arith.mulf %257, %251 : vector<2x128xf32>
        %259 = arith.mulf %258, %251 : vector<2x128xf32>
        %260 = vector.broadcast %cst_18 : f32 to vector<2x128xf32>
        %261 = arith.subf %260, %243 : vector<2x128xf32>
        %262 = arith.divf %243, %261 : vector<2x128xf32>
        %263 = math.log %262 : vector<2x128xf32>
        %264 = vector.broadcast %5 : vector<1x128xf32> to vector<2x128xf32>
        %265 = arith.mulf %264, %263 : vector<2x128xf32>
        %266 = vector.broadcast %4 : vector<1x128xf32> to vector<2x128xf32>
        %267 = arith.addf %266, %265 : vector<2x128xf32>
        %268 = tpu.reciprocal %254 {approx = true} : vector<2x128xf32> -> vector<2x128xf32>
        %269 = arith.mulf %254, %268 : vector<2x128xf32>
        %cst_58 = arith.constant 2.000000e+00 : f32
        %270 = vector.broadcast %cst_58 : f32 to vector<2x128xf32>
        %271 = arith.subf %270, %269 : vector<2x128xf32>
        %272 = arith.mulf %268, %271 : vector<2x128xf32>
        %273 = vector.broadcast %5 : vector<1x128xf32> to vector<2x128xf32>
        %274 = arith.mulf %273, %272 : vector<2x128xf32>
        %275 = vector.broadcast %0 : vector<1x128xf32> to vector<2x128xf32>
        %276 = arith.mulf %275, %256 : vector<2x128xf32>
        %277 = arith.addf %267, %276 : vector<2x128xf32>
        %cst_59 = arith.constant -2.000000e+00 : f32
        %278 = vector.broadcast %cst_59 : f32 to vector<2x128xf32>
        %279 = arith.mulf %278, %255 : vector<2x128xf32>
        %280 = vector.broadcast %0 : vector<1x128xf32> to vector<2x128xf32>
        %281 = arith.mulf %280, %279 : vector<2x128xf32>
        %282 = arith.addf %274, %281 : vector<2x128xf32>
        %283 = arith.mulf %254, %255 : vector<2x128xf32>
        %cst_60 = arith.constant 2.000000e+00 : f32
        %284 = vector.broadcast %cst_60 : f32 to vector<2x128xf32>
        %285 = arith.mulf %284, %283 : vector<2x128xf32>
        %286 = arith.subf %257, %285 : vector<2x128xf32>
        %287 = vector.broadcast %1 : vector<1x128xf32> to vector<2x128xf32>
        %288 = arith.mulf %287, %286 : vector<2x128xf32>
        %289 = arith.addf %277, %288 : vector<2x128xf32>
        %cst_61 = arith.constant -6.000000e+00 : f32
        %290 = vector.broadcast %cst_61 : f32 to vector<2x128xf32>
        %291 = arith.mulf %290, %256 : vector<2x128xf32>
        %292 = vector.broadcast %1 : vector<1x128xf32> to vector<2x128xf32>
        %293 = arith.mulf %292, %291 : vector<2x128xf32>
        %294 = arith.addf %282, %293 : vector<2x128xf32>
        %295 = arith.mulf %254, %256 : vector<2x128xf32>
        %cst_62 = arith.constant 4.000000e+00 : f32
        %296 = vector.broadcast %cst_62 : f32 to vector<2x128xf32>
        %297 = arith.mulf %296, %295 : vector<2x128xf32>
        %298 = arith.subf %258, %297 : vector<2x128xf32>
        %299 = vector.broadcast %2 : vector<1x128xf32> to vector<2x128xf32>
        %300 = arith.mulf %299, %298 : vector<2x128xf32>
        %301 = arith.addf %289, %300 : vector<2x128xf32>
        %cst_63 = arith.constant -1.000000e+01 : f32
        %302 = vector.broadcast %cst_63 : f32 to vector<2x128xf32>
        %303 = arith.mulf %302, %257 : vector<2x128xf32>
        %304 = arith.mulf %254, %255 : vector<2x128xf32>
        %cst_64 = arith.constant 8.000000e+00 : f32
        %305 = vector.broadcast %cst_64 : f32 to vector<2x128xf32>
        %306 = arith.mulf %305, %304 : vector<2x128xf32>
        %307 = arith.addf %303, %306 : vector<2x128xf32>
        %308 = vector.broadcast %2 : vector<1x128xf32> to vector<2x128xf32>
        %309 = arith.mulf %308, %307 : vector<2x128xf32>
        %310 = arith.addf %294, %309 : vector<2x128xf32>
        %311 = arith.mulf %254, %257 : vector<2x128xf32>
        %cst_65 = arith.constant 6.000000e+00 : f32
        %312 = vector.broadcast %cst_65 : f32 to vector<2x128xf32>
        %313 = arith.mulf %312, %311 : vector<2x128xf32>
        %314 = arith.subf %259, %313 : vector<2x128xf32>
        %315 = vector.broadcast %3 : vector<1x128xf32> to vector<2x128xf32>
        %316 = arith.mulf %315, %314 : vector<2x128xf32>
        %317 = arith.addf %301, %316 : vector<2x128xf32>
        %cst_66 = arith.constant -1.400000e+01 : f32
        %318 = vector.broadcast %cst_66 : f32 to vector<2x128xf32>
        %319 = arith.mulf %318, %258 : vector<2x128xf32>
        %320 = arith.mulf %254, %256 : vector<2x128xf32>
        %cst_67 = arith.constant 2.400000e+01 : f32
        %321 = vector.broadcast %cst_67 : f32 to vector<2x128xf32>
        %322 = arith.mulf %321, %320 : vector<2x128xf32>
        %323 = arith.addf %319, %322 : vector<2x128xf32>
        %324 = vector.broadcast %3 : vector<1x128xf32> to vector<2x128xf32>
        %325 = arith.mulf %324, %323 : vector<2x128xf32>
        %326 = arith.addf %310, %325 : vector<2x128xf32>
        %327 = vector.broadcast %arg5 : vector<1x128xf32> to vector<2x128xf32>
        %328 = arith.subf %317, %327 : vector<2x128xf32>
        %cst_68 = arith.constant 0.000000e+00 : f32
        %329 = vector.broadcast %cst_68 : f32 to vector<2x128xf32>
        %330 = arith.subf %329, %328 : vector<2x128xf32>
        %331 = tpu.reciprocal %326 {approx = true} : vector<2x128xf32> -> vector<2x128xf32>
        %332 = arith.mulf %326, %331 : vector<2x128xf32>
        %cst_69 = arith.constant 2.000000e+00 : f32
        %333 = vector.broadcast %cst_69 : f32 to vector<2x128xf32>
        %334 = arith.subf %333, %332 : vector<2x128xf32>
        %335 = arith.mulf %331, %334 : vector<2x128xf32>
        %336 = arith.mulf %330, %335 : vector<2x128xf32>
        %337 = arith.addf %243, %336 : vector<2x128xf32>
        %cst_70 = arith.constant 1.000000e-07 : f32
        %cst_71 = arith.constant 0.99999988 : f32
        %338 = vector.broadcast %cst_70 : f32 to vector<2x128xf32>
        %339 = arith.maximumf %338, %337 : vector<2x128xf32>
        %340 = vector.broadcast %cst_71 : f32 to vector<2x128xf32>
        %341 = arith.minimumf %340, %339 : vector<2x128xf32>
        %342 = arith.select %247, %341, %243 : vector<2x128xi1>, vector<2x128xf32>
        %343 = arith.select %247, %336, %244 : vector<2x128xi1>, vector<2x128xf32>
        %344 = math.absf %343 : vector<2x128xf32>
        %cst_72 = arith.constant 9.99999997E-7 : f32
        %345 = vector.broadcast %cst_72 : f32 to vector<2x128xf32>
        %346 = arith.cmpf ogt, %344, %345 : vector<2x128xf32>
        %cst_73 = arith.constant 2.000000e+00 : f32
        %347 = vector.broadcast %cst_73 : f32 to vector<2x128xf32>
        %348 = arith.mulf %347, %342 : vector<2x128xf32>
        %349 = vector.broadcast %cst_18 : f32 to vector<2x128xf32>
        %350 = arith.subf %349, %348 : vector<2x128xf32>
        %351 = vector.broadcast %cst_18 : f32 to vector<2x128xf32>
        %352 = arith.subf %351, %342 : vector<2x128xf32>
        %353 = arith.mulf %342, %352 : vector<2x128xf32>
        %cst_74 = arith.constant 1.000000e+00 : f32
        %354 = vector.broadcast %cst_74 : f32 to vector<2x128xf32>
        %355 = arith.mulf %354, %350 : vector<2x128xf32>
        %356 = arith.mulf %355, %350 : vector<2x128xf32>
        %357 = arith.mulf %356, %350 : vector<2x128xf32>
        %358 = arith.mulf %357, %350 : vector<2x128xf32>
        %359 = vector.broadcast %cst_18 : f32 to vector<2x128xf32>
        %360 = arith.subf %359, %342 : vector<2x128xf32>
        %361 = arith.divf %342, %360 : vector<2x128xf32>
        %362 = math.log %361 : vector<2x128xf32>
        %363 = vector.broadcast %5 : vector<1x128xf32> to vector<2x128xf32>
        %364 = arith.mulf %363, %362 : vector<2x128xf32>
        %365 = vector.broadcast %4 : vector<1x128xf32> to vector<2x128xf32>
        %366 = arith.addf %365, %364 : vector<2x128xf32>
        %367 = tpu.reciprocal %353 {approx = true} : vector<2x128xf32> -> vector<2x128xf32>
        %368 = arith.mulf %353, %367 : vector<2x128xf32>
        %cst_75 = arith.constant 2.000000e+00 : f32
        %369 = vector.broadcast %cst_75 : f32 to vector<2x128xf32>
        %370 = arith.subf %369, %368 : vector<2x128xf32>
        %371 = arith.mulf %367, %370 : vector<2x128xf32>
        %372 = vector.broadcast %5 : vector<1x128xf32> to vector<2x128xf32>
        %373 = arith.mulf %372, %371 : vector<2x128xf32>
        %374 = vector.broadcast %0 : vector<1x128xf32> to vector<2x128xf32>
        %375 = arith.mulf %374, %355 : vector<2x128xf32>
        %376 = arith.addf %366, %375 : vector<2x128xf32>
        %cst_76 = arith.constant -2.000000e+00 : f32
        %377 = vector.broadcast %cst_76 : f32 to vector<2x128xf32>
        %378 = arith.mulf %377, %354 : vector<2x128xf32>
        %379 = vector.broadcast %0 : vector<1x128xf32> to vector<2x128xf32>
        %380 = arith.mulf %379, %378 : vector<2x128xf32>
        %381 = arith.addf %373, %380 : vector<2x128xf32>
        %382 = arith.mulf %353, %354 : vector<2x128xf32>
        %cst_77 = arith.constant 2.000000e+00 : f32
        %383 = vector.broadcast %cst_77 : f32 to vector<2x128xf32>
        %384 = arith.mulf %383, %382 : vector<2x128xf32>
        %385 = arith.subf %356, %384 : vector<2x128xf32>
        %386 = vector.broadcast %1 : vector<1x128xf32> to vector<2x128xf32>
        %387 = arith.mulf %386, %385 : vector<2x128xf32>
        %388 = arith.addf %376, %387 : vector<2x128xf32>
        %cst_78 = arith.constant -6.000000e+00 : f32
        %389 = vector.broadcast %cst_78 : f32 to vector<2x128xf32>
        %390 = arith.mulf %389, %355 : vector<2x128xf32>
        %391 = vector.broadcast %1 : vector<1x128xf32> to vector<2x128xf32>
        %392 = arith.mulf %391, %390 : vector<2x128xf32>
        %393 = arith.addf %381, %392 : vector<2x128xf32>
        %394 = arith.mulf %353, %355 : vector<2x128xf32>
        %cst_79 = arith.constant 4.000000e+00 : f32
        %395 = vector.broadcast %cst_79 : f32 to vector<2x128xf32>
        %396 = arith.mulf %395, %394 : vector<2x128xf32>
        %397 = arith.subf %357, %396 : vector<2x128xf32>
        %398 = vector.broadcast %2 : vector<1x128xf32> to vector<2x128xf32>
        %399 = arith.mulf %398, %397 : vector<2x128xf32>
        %400 = arith.addf %388, %399 : vector<2x128xf32>
        %cst_80 = arith.constant -1.000000e+01 : f32
        %401 = vector.broadcast %cst_80 : f32 to vector<2x128xf32>
        %402 = arith.mulf %401, %356 : vector<2x128xf32>
        %403 = arith.mulf %353, %354 : vector<2x128xf32>
        %cst_81 = arith.constant 8.000000e+00 : f32
        %404 = vector.broadcast %cst_81 : f32 to vector<2x128xf32>
        %405 = arith.mulf %404, %403 : vector<2x128xf32>
        %406 = arith.addf %402, %405 : vector<2x128xf32>
        %407 = vector.broadcast %2 : vector<1x128xf32> to vector<2x128xf32>
        %408 = arith.mulf %407, %406 : vector<2x128xf32>
        %409 = arith.addf %393, %408 : vector<2x128xf32>
        %410 = arith.mulf %353, %356 : vector<2x128xf32>
        %cst_82 = arith.constant 6.000000e+00 : f32
        %411 = vector.broadcast %cst_82 : f32 to vector<2x128xf32>
        %412 = arith.mulf %411, %410 : vector<2x128xf32>
        %413 = arith.subf %358, %412 : vector<2x128xf32>
        %414 = vector.broadcast %3 : vector<1x128xf32> to vector<2x128xf32>
        %415 = arith.mulf %414, %413 : vector<2x128xf32>
        %416 = arith.addf %400, %415 : vector<2x128xf32>
        %cst_83 = arith.constant -1.400000e+01 : f32
        %417 = vector.broadcast %cst_83 : f32 to vector<2x128xf32>
        %418 = arith.mulf %417, %357 : vector<2x128xf32>
        %419 = arith.mulf %353, %355 : vector<2x128xf32>
        %cst_84 = arith.constant 2.400000e+01 : f32
        %420 = vector.broadcast %cst_84 : f32 to vector<2x128xf32>
        %421 = arith.mulf %420, %419 : vector<2x128xf32>
        %422 = arith.addf %418, %421 : vector<2x128xf32>
        %423 = vector.broadcast %3 : vector<1x128xf32> to vector<2x128xf32>
        %424 = arith.mulf %423, %422 : vector<2x128xf32>
        %425 = arith.addf %409, %424 : vector<2x128xf32>
        %426 = vector.broadcast %arg5 : vector<1x128xf32> to vector<2x128xf32>
        %427 = arith.subf %416, %426 : vector<2x128xf32>
        %cst_85 = arith.constant 0.000000e+00 : f32
        %428 = vector.broadcast %cst_85 : f32 to vector<2x128xf32>
        %429 = arith.subf %428, %427 : vector<2x128xf32>
        %430 = tpu.reciprocal %425 {approx = true} : vector<2x128xf32> -> vector<2x128xf32>
        %431 = arith.mulf %425, %430 : vector<2x128xf32>
        %cst_86 = arith.constant 2.000000e+00 : f32
        %432 = vector.broadcast %cst_86 : f32 to vector<2x128xf32>
        %433 = arith.subf %432, %431 : vector<2x128xf32>
        %434 = arith.mulf %430, %433 : vector<2x128xf32>
        %435 = arith.mulf %429, %434 : vector<2x128xf32>
        %436 = arith.addf %342, %435 : vector<2x128xf32>
        %cst_87 = arith.constant 1.000000e-07 : f32
        %cst_88 = arith.constant 0.99999988 : f32
        %437 = vector.broadcast %cst_87 : f32 to vector<2x128xf32>
        %438 = arith.maximumf %437, %436 : vector<2x128xf32>
        %439 = vector.broadcast %cst_88 : f32 to vector<2x128xf32>
        %440 = arith.minimumf %439, %438 : vector<2x128xf32>
        %441 = arith.select %346, %440, %342 : vector<2x128xi1>, vector<2x128xf32>
        %442 = arith.select %346, %435, %343 : vector<2x128xi1>, vector<2x128xf32>
        %443 = math.absf %442 : vector<2x128xf32>
        %cst_89 = arith.constant 9.99999997E-7 : f32
        %444 = vector.broadcast %cst_89 : f32 to vector<2x128xf32>
        %445 = arith.cmpf ogt, %443, %444 : vector<2x128xf32>
        %cst_90 = arith.constant 2.000000e+00 : f32
        %446 = vector.broadcast %cst_90 : f32 to vector<2x128xf32>
        %447 = arith.mulf %446, %441 : vector<2x128xf32>
        %448 = vector.broadcast %cst_18 : f32 to vector<2x128xf32>
        %449 = arith.subf %448, %447 : vector<2x128xf32>
        %450 = vector.broadcast %cst_18 : f32 to vector<2x128xf32>
        %451 = arith.subf %450, %441 : vector<2x128xf32>
        %452 = arith.mulf %441, %451 : vector<2x128xf32>
        %cst_91 = arith.constant 1.000000e+00 : f32
        %453 = vector.broadcast %cst_91 : f32 to vector<2x128xf32>
        %454 = arith.mulf %453, %449 : vector<2x128xf32>
        %455 = arith.mulf %454, %449 : vector<2x128xf32>
        %456 = arith.mulf %455, %449 : vector<2x128xf32>
        %457 = arith.mulf %456, %449 : vector<2x128xf32>
        %458 = vector.broadcast %cst_18 : f32 to vector<2x128xf32>
        %459 = arith.subf %458, %441 : vector<2x128xf32>
        %460 = arith.divf %441, %459 : vector<2x128xf32>
        %461 = math.log %460 : vector<2x128xf32>
        %462 = vector.broadcast %5 : vector<1x128xf32> to vector<2x128xf32>
        %463 = arith.mulf %462, %461 : vector<2x128xf32>
        %464 = vector.broadcast %4 : vector<1x128xf32> to vector<2x128xf32>
        %465 = arith.addf %464, %463 : vector<2x128xf32>
        %466 = tpu.reciprocal %452 {approx = true} : vector<2x128xf32> -> vector<2x128xf32>
        %467 = arith.mulf %452, %466 : vector<2x128xf32>
        %cst_92 = arith.constant 2.000000e+00 : f32
        %468 = vector.broadcast %cst_92 : f32 to vector<2x128xf32>
        %469 = arith.subf %468, %467 : vector<2x128xf32>
        %470 = arith.mulf %466, %469 : vector<2x128xf32>
        %471 = vector.broadcast %5 : vector<1x128xf32> to vector<2x128xf32>
        %472 = arith.mulf %471, %470 : vector<2x128xf32>
        %473 = vector.broadcast %0 : vector<1x128xf32> to vector<2x128xf32>
        %474 = arith.mulf %473, %454 : vector<2x128xf32>
        %475 = arith.addf %465, %474 : vector<2x128xf32>
        %cst_93 = arith.constant -2.000000e+00 : f32
        %476 = vector.broadcast %cst_93 : f32 to vector<2x128xf32>
        %477 = arith.mulf %476, %453 : vector<2x128xf32>
        %478 = vector.broadcast %0 : vector<1x128xf32> to vector<2x128xf32>
        %479 = arith.mulf %478, %477 : vector<2x128xf32>
        %480 = arith.addf %472, %479 : vector<2x128xf32>
        %481 = arith.mulf %452, %453 : vector<2x128xf32>
        %cst_94 = arith.constant 2.000000e+00 : f32
        %482 = vector.broadcast %cst_94 : f32 to vector<2x128xf32>
        %483 = arith.mulf %482, %481 : vector<2x128xf32>
        %484 = arith.subf %455, %483 : vector<2x128xf32>
        %485 = vector.broadcast %1 : vector<1x128xf32> to vector<2x128xf32>
        %486 = arith.mulf %485, %484 : vector<2x128xf32>
        %487 = arith.addf %475, %486 : vector<2x128xf32>
        %cst_95 = arith.constant -6.000000e+00 : f32
        %488 = vector.broadcast %cst_95 : f32 to vector<2x128xf32>
        %489 = arith.mulf %488, %454 : vector<2x128xf32>
        %490 = vector.broadcast %1 : vector<1x128xf32> to vector<2x128xf32>
        %491 = arith.mulf %490, %489 : vector<2x128xf32>
        %492 = arith.addf %480, %491 : vector<2x128xf32>
        %493 = arith.mulf %452, %454 : vector<2x128xf32>
        %cst_96 = arith.constant 4.000000e+00 : f32
        %494 = vector.broadcast %cst_96 : f32 to vector<2x128xf32>
        %495 = arith.mulf %494, %493 : vector<2x128xf32>
        %496 = arith.subf %456, %495 : vector<2x128xf32>
        %497 = vector.broadcast %2 : vector<1x128xf32> to vector<2x128xf32>
        %498 = arith.mulf %497, %496 : vector<2x128xf32>
        %499 = arith.addf %487, %498 : vector<2x128xf32>
        %cst_97 = arith.constant -1.000000e+01 : f32
        %500 = vector.broadcast %cst_97 : f32 to vector<2x128xf32>
        %501 = arith.mulf %500, %455 : vector<2x128xf32>
        %502 = arith.mulf %452, %453 : vector<2x128xf32>
        %cst_98 = arith.constant 8.000000e+00 : f32
        %503 = vector.broadcast %cst_98 : f32 to vector<2x128xf32>
        %504 = arith.mulf %503, %502 : vector<2x128xf32>
        %505 = arith.addf %501, %504 : vector<2x128xf32>
        %506 = vector.broadcast %2 : vector<1x128xf32> to vector<2x128xf32>
        %507 = arith.mulf %506, %505 : vector<2x128xf32>
        %508 = arith.addf %492, %507 : vector<2x128xf32>
        %509 = arith.mulf %452, %455 : vector<2x128xf32>
        %cst_99 = arith.constant 6.000000e+00 : f32
        %510 = vector.broadcast %cst_99 : f32 to vector<2x128xf32>
        %511 = arith.mulf %510, %509 : vector<2x128xf32>
        %512 = arith.subf %457, %511 : vector<2x128xf32>
        %513 = vector.broadcast %3 : vector<1x128xf32> to vector<2x128xf32>
        %514 = arith.mulf %513, %512 : vector<2x128xf32>
        %515 = arith.addf %499, %514 : vector<2x128xf32>
        %cst_100 = arith.constant -1.400000e+01 : f32
        %516 = vector.broadcast %cst_100 : f32 to vector<2x128xf32>
        %517 = arith.mulf %516, %456 : vector<2x128xf32>
        %518 = arith.mulf %452, %454 : vector<2x128xf32>
        %cst_101 = arith.constant 2.400000e+01 : f32
        %519 = vector.broadcast %cst_101 : f32 to vector<2x128xf32>
        %520 = arith.mulf %519, %518 : vector<2x128xf32>
        %521 = arith.addf %517, %520 : vector<2x128xf32>
        %522 = vector.broadcast %3 : vector<1x128xf32> to vector<2x128xf32>
        %523 = arith.mulf %522, %521 : vector<2x128xf32>
        %524 = arith.addf %508, %523 : vector<2x128xf32>
        %525 = vector.broadcast %arg5 : vector<1x128xf32> to vector<2x128xf32>
        %526 = arith.subf %515, %525 : vector<2x128xf32>
        %cst_102 = arith.constant 0.000000e+00 : f32
        %527 = vector.broadcast %cst_102 : f32 to vector<2x128xf32>
        %528 = arith.subf %527, %526 : vector<2x128xf32>
        %529 = tpu.reciprocal %524 {approx = true} : vector<2x128xf32> -> vector<2x128xf32>
        %530 = arith.mulf %524, %529 : vector<2x128xf32>
        %cst_103 = arith.constant 2.000000e+00 : f32
        %531 = vector.broadcast %cst_103 : f32 to vector<2x128xf32>
        %532 = arith.subf %531, %530 : vector<2x128xf32>
        %533 = arith.mulf %529, %532 : vector<2x128xf32>
        %534 = arith.mulf %528, %533 : vector<2x128xf32>
        %535 = arith.addf %441, %534 : vector<2x128xf32>
        %cst_104 = arith.constant 1.000000e-07 : f32
        %cst_105 = arith.constant 0.99999988 : f32
        %536 = vector.broadcast %cst_104 : f32 to vector<2x128xf32>
        %537 = arith.maximumf %536, %535 : vector<2x128xf32>
        %538 = vector.broadcast %cst_105 : f32 to vector<2x128xf32>
        %539 = arith.minimumf %538, %537 : vector<2x128xf32>
        %540 = arith.select %445, %539, %441 : vector<2x128xi1>, vector<2x128xf32>
        %541 = arith.select %445, %534, %442 : vector<2x128xi1>, vector<2x128xf32>
        %542 = math.absf %541 : vector<2x128xf32>
        %cst_106 = arith.constant 9.99999997E-7 : f32
        %543 = vector.broadcast %cst_106 : f32 to vector<2x128xf32>
        %544 = arith.cmpf ogt, %542, %543 : vector<2x128xf32>
        %cst_107 = arith.constant 1.000000e+00 : f32
        %cst_108 = arith.constant 0.000000e+00 : f32
        %545 = vector.broadcast %cst_107 : f32 to vector<2x128xf32>
        %546 = vector.broadcast %cst_108 : f32 to vector<2x128xf32>
        %547 = arith.select %544, %545, %546 : vector<2x128xi1>, vector<2x128xf32>
        %548 = vector.shape_cast %547 : vector<2x128xf32> to vector<1x2x128xf32>
        %cst_109 = arith.constant dense<0xFF800000> : vector<1xf32>
        %549 = vector.multi_reduction <maximumf>, %548, %cst_109 [1, 2] : vector<1x2x128xf32> to vector<1xf32>
        %550 = vector.shape_cast %549 : vector<1xf32> to vector<1x1x1xf32>
        %551 = vector.extract %550[0, 0, 0] : f32 from vector<1x1x1xf32>
        %c4_i32 = arith.constant 4 : i32
        %552 = arith.addi %arg11, %c4_i32 : i32
        scf.yield %540, %541, %551, %552 : vector<2x128xf32>, vector<2x128xf32>, f32, i32
      }
      %cst_30 = arith.constant 2.000000e+00 : f32
      %84 = vector.broadcast %cst_30 : f32 to vector<2x128xf32>
      %85 = arith.mulf %84, %83#0 : vector<2x128xf32>
      %86 = vector.broadcast %cst_18 : f32 to vector<2x128xf32>
      %87 = arith.subf %86, %85 : vector<2x128xf32>
      %88 = vector.broadcast %cst_18 : f32 to vector<2x128xf32>
      %89 = arith.subf %88, %83#0 : vector<2x128xf32>
      %90 = arith.mulf %83#0, %89 : vector<2x128xf32>
      %91 = vector.broadcast %cst_18 : f32 to vector<2x128xf32>
      %92 = arith.subf %91, %83#0 : vector<2x128xf32>
      %93 = tpu.concatenate %83#0, %92 in 0 : vector<2x128xf32>, vector<2x128xf32> -> vector<4x128xf32>
      %94 = math.log %93 : vector<4x128xf32>
      %95 = vector.extract_strided_slice %94 {offsets = [0, 0], sizes = [2, 128], strides = [1, 1]} : vector<4x128xf32> to vector<2x128xf32>
      %96 = vector.extract_strided_slice %94 {offsets = [2, 0], sizes = [2, 128], strides = [1, 1]} : vector<4x128xf32> to vector<2x128xf32>
      %97 = vector.broadcast %4 : vector<1x128xf32> to vector<2x128xf32>
      %98 = arith.mulf %83#0, %97 : vector<2x128xf32>
      %99 = arith.mulf %83#0, %95 : vector<2x128xf32>
      %100 = vector.broadcast %cst_18 : f32 to vector<2x128xf32>
      %101 = arith.subf %100, %83#0 : vector<2x128xf32>
      %102 = arith.mulf %101, %96 : vector<2x128xf32>
      %103 = arith.addf %99, %102 : vector<2x128xf32>
      %104 = vector.broadcast %5 : vector<1x128xf32> to vector<2x128xf32>
      %105 = arith.mulf %104, %103 : vector<2x128xf32>
      %106 = arith.addf %98, %105 : vector<2x128xf32>
      %cst_31 = arith.constant 1.000000e+00 : f32
      %107 = vector.broadcast %cst_31 : f32 to vector<2x128xf32>
      %108 = arith.mulf %90, %107 : vector<2x128xf32>
      %109 = vector.broadcast %0 : vector<1x128xf32> to vector<2x128xf32>
      %110 = arith.mulf %109, %108 : vector<2x128xf32>
      %111 = arith.addf %106, %110 : vector<2x128xf32>
      %112 = arith.mulf %107, %87 : vector<2x128xf32>
      %113 = arith.mulf %90, %112 : vector<2x128xf32>
      %114 = vector.broadcast %1 : vector<1x128xf32> to vector<2x128xf32>
      %115 = arith.mulf %114, %113 : vector<2x128xf32>
      %116 = arith.addf %111, %115 : vector<2x128xf32>
      %117 = arith.mulf %112, %87 : vector<2x128xf32>
      %118 = arith.mulf %90, %117 : vector<2x128xf32>
      %119 = vector.broadcast %2 : vector<1x128xf32> to vector<2x128xf32>
      %120 = arith.mulf %119, %118 : vector<2x128xf32>
      %121 = arith.addf %116, %120 : vector<2x128xf32>
      %122 = arith.mulf %117, %87 : vector<2x128xf32>
      %123 = arith.mulf %90, %122 : vector<2x128xf32>
      %124 = vector.broadcast %3 : vector<1x128xf32> to vector<2x128xf32>
      %125 = arith.mulf %124, %123 : vector<2x128xf32>
      %126 = arith.addf %121, %125 : vector<2x128xf32>
      %127 = arith.mulf %122, %87 : vector<2x128xf32>
      %128 = arith.mulf %11, %126 : vector<2x128xf32>
      %cst_32 = arith.constant dense<0.000000e+00> : vector<128xf32>
      %129 = vector.multi_reduction <add>, %128, %cst_32 [0] : vector<2x128xf32> to vector<128xf32>
      %130 = vector.shape_cast %129 : vector<128xf32> to vector<1x128xf32>
      %131 = arith.mulf %11, %83#0 : vector<2x128xf32>
      %cst_33 = arith.constant dense<0.000000e+00> : vector<128xf32>
      %132 = vector.multi_reduction <add>, %131, %cst_33 [0] : vector<2x128xf32> to vector<128xf32>
      %133 = vector.shape_cast %132 : vector<128xf32> to vector<1x128xf32>
      %134 = arith.divf %130, %133 : vector<1x128xf32>
      %135 = arith.subf %134, %arg5 : vector<1x128xf32>
      %136 = math.absf %135 : vector<1x128xf32>
      %cst_34 = arith.constant 5.000000e-01 : f32
      %137 = vector.broadcast %cst_34 : f32 to vector<1x128xf32>
      %138 = arith.cmpf ogt, %arg6, %137 : vector<1x128xf32>
      %cst_35 = arith.constant 9.99999974E-5 : f32
      %139 = vector.broadcast %cst_35 : f32 to vector<1x128xf32>
      %140 = arith.cmpf ogt, %136, %139 : vector<1x128xf32>
      %141 = arith.andi %138, %140 : vector<1x128xi1>
      %cst_36 = arith.constant 1.000000e+00 : f32
      %cst_37 = arith.constant 0.000000e+00 : f32
      %142 = vector.broadcast %cst_36 : f32 to vector<1x128xf32>
      %143 = vector.broadcast %cst_37 : f32 to vector<1x128xf32>
      %144 = arith.select %141, %142, %143 : vector<1x128xi1>, vector<1x128xf32>
      %c1_i32 = arith.constant 1 : i32
      %145 = arith.addi %arg7, %c1_i32 : i32
      scf.yield %83#0, %134, %144, %145 : vector<2x128xf32>, vector<1x128xf32>, vector<1x128xf32>, i32
    }
    %c0_20 = arith.constant 0 : index
    %c0_21 = arith.constant 0 : index
    %65 = vector.load %arg3[%c0_20, %c0_21] : memref<2x128xf32, #tpu.memory_space<vmem>>, vector<2x128xf32>
    tpu.vector_store %arg3[%c0_20, %c0_21], %64#0 {strides = array<i32>} : memref<2x128xf32, #tpu.memory_space<vmem>>, vector<2x128xf32>,
    return
  }
  func.func @transform_0(%arg0: i32) -> (i32, i32) {
    %c0_i32 = arith.constant 0 : i32
    %c0_i32_0 = arith.constant 0 : i32
    return %c0_i32, %arg0 : i32, i32
  }
  func.func @transform_1(%arg0: i32) -> (i32, i32) {
    %c0_i32 = arith.constant 0 : i32
    %c0_i32_0 = arith.constant 0 : i32
    return %c0_i32, %arg0 : i32, i32
  }
  func.func @transform_2(%arg0: i32) -> (i32, i32) {
    %c0_i32 = arith.constant 0 : i32
    %c0_i32_0 = arith.constant 0 : i32
    return %c0_i32, %arg0 : i32, i32
  }
}

</mosaic_0001>

<bundles_post_ra>
// kernel: tpu_custom_call.1
= control target key start
LH: loop header
LB: loop body
LE: loop exit
PB: predicated region body
PF: predicated region fallthrough
CT: control target
= control target key end

     0   :  { %7 = vsyncpa [#allocation3], 0  ;;  %s1164_s0 = inlined_call_operand.hbm [shape: f32[2,128], index: 0, kind: input, shape index: {}]   ;;  %s1165_s1 = inlined_call_operand.hbm [shape: f32[6,128], index: 1, kind: input, shape index: {}]   ;;  %s1166_s2 = inlined_call_operand.hbm [shape: f32[2,128], index: 2, kind: output, shape index: {}]  }
   0x1   :  { %8 = vsyncpa [#allocation6], 0 }
   0x2   :  { %9 = vsyncpa [#allocation4], 0  ;;  %s15_s11 = sshll.u32 %s1164_s0, 4  ;;  %s875_s12 = smov [#allocation2]   ;;  %s16_s11 = int_to_ptr.hbm [resolvable:$true] %s15_s11 }
   0x3   :  { %s17_s13 = sshll.u32 %s875_s12, 4  ;;  %s26_s16 = sshll.u32 %s1165_s1, 4  ;;  %s18_s13 = int_to_ptr.vmem [resolvable:$true] %s17_s13  ;;  %s27_s16 = int_to_ptr.hbm [resolvable:$true] %s26_s16 }
   0x4   :  { %20 = dma.hbm_to_vmem [thread:$0]  %s16_s11, 32, %s18_s13, [#allocation3]  }
   0x5   :  { %s876_s17 = smov [#allocation5]  }
   0x6   :  { %s28_s18 = sshll.u32 %s876_s17, 4  ;;  %s29_s18 = int_to_ptr.vmem [resolvable:$true] %s28_s18 }
   0x7   :  { %31 = dma.hbm_to_vmem [thread:$0]  %s27_s16, 128, %s29_s18, [#allocation6]  }
   0x8   :  { %833 = dma.done.wait [#allocation3], 32  }
   0x9   :  { %834 = vsyncadd [#allocation3], 4294967264 }
   0xa   :  { %835 = dma.done.wait [#allocation6], 128  }
   0xb   :  { %836 = vsyncadd [#allocation6], 4294967168  ;;  %v46_v0 = vlaneseq  ;;  %v877_v2 = vmov -1.0   ;;  %v905_v4 = vld [vmem:[#allocation2] sm:$0x3]   ;;  %vm58_vm1 = vcmask 1041408  }
   0xc   :  { %v53_v5 = vsub.f32 1.0, %v905_v4  ;;  %v51_v12 = vmul.f32 2.0, %v905_v4  ;;  %v915_v21 = vld [vmem:[#allocation5 + $0x4] ss:$0 sm:$0xff]  ;;  %v918_v26 = vld [vmem:[#allocation5 + $0x5] ss:$0 sm:$0xff] }
   0xd   :  { %v47_v1 = vshrl.u32 %v46_v0, 7  ;;  %v920_v27 = vld [vmem:[#allocation5] ss:$0 sm:$0xff]  ;;  %v63_v28 = vmul.f32 %v915_v21, %v905_v4  ;;  %v924_v31 = vld [vmem:[#allocation5 + $0x1] ss:$0 sm:$0xff] }
   0xe   :  { %v56_v7 = vrot.slane %v53_v5, 6  ;;  %v52_v15 = vsub.f32 1.0, %v51_v12  ;;  %v54_v20 = vmul.f32 %v53_v5, %v905_v4  ;;  %v928_v36 = vld [vmem:[#allocation5 + $0x2] ss:$0 sm:$0xff]  ;;  %v931_v41 = vld [vmem:[#allocation5 + $0x3] ss:$0 sm:$0xff] }
   0xf   :  { %vm48_vm0 = vcmp.eq.s32.totalorder %v47_v1, 0 }
  0x10   :  { %v903_v3 = vsel %vm48_vm0, 1.0, %v877_v2  ;;  %v59_v10 = vsel %vm58_vm1, %v905_v4, %v56_v7  ;;  %v80_v24 = vmul.f32 %v52_v15, %v52_v15  ;;  %v76_v30 = vmul.f32 %v54_v20, %v52_v15 }
  0x11   :  { %v98_v6 = vmul.f32 %v905_v4, %v903_v3  ;;  %685 = vlog2.f32 %v59_v10  ;;  %v74_v34 = vmul.f32 %v920_v27, %v54_v20  ;;  %v878_v2 = vmov 1.0  }
  0x12   :  { %v85_v32 = vmul.f32 %v80_v24, %v52_v15  ;;  %v81_v35 = vmul.f32 %v80_v24, %v54_v20  ;;  %v78_v39 = vmul.f32 %v924_v31, %v76_v30  ;;  %575 = vmax.xlane.f32.xlu0 %v878_v2 }
  0x13   :  { %v99_v8 = vsel %vm58_vm1, %v98_v6, 0.0  ;;  %v1167_v6 = vmov %v905_v4 }
  0x14   :  { %v100_v9 = vrot.slane %v99_v8, 4  ;;  %v86_v40 = vmul.f32 %v85_v32, %v54_v20  ;;  %v83_v43 = vmul.f32 %v928_v36, %v81_v35 }
  0x16   :  { %v101_v11 = vadd.f32 %v100_v9, %v99_v8  ;;  %v88_v46 = vmul.f32 %v931_v41, %v86_v40 }
  0x17   :  { %v686_v16 = vpop.eup %685 }
  0x18   :  { %v102_v13 = vrot.slane %v101_v11, 2  ;;  %v61_v18 = vmul.f32 0.6931472, %v686_v16 }
  0x1a   :  { %v103_v14 = vadd.f32 %v102_v13, %v101_v11  ;;  %v64_v22 = vmul.f32 %v61_v18, %v905_v4  ;;  %v66_v23 = vrot.slane %v61_v18, 2 }
  0x1c   :  { %v104_v17 = vrot.slane %v103_v14, 1  ;;  %v68_v25 = vmul.f32 %v66_v23, %v53_v5 }
  0x1e   :  { %v105_v19 = vadd.f32 %v104_v17, %v103_v14  ;;  %v69_v29 = vadd.f32 %v68_v25, %v64_v22 }
  0x20   :  { %687 = vrcp.f32 %v105_v19  ;;  %v71_v33 = vmul.f32 %v918_v26, %v69_v29  ;;  %vm111_vm2 = vweird.f32 %v105_v19  ;;  %v117_v54 = vand.u32 2147483648, %v105_v19 }
  0x21   :  { %v115_v57 = vand.u32 2147483647, %v105_v19 }
  0x22   :  { %v72_v38 = vadd.f32 %v71_v33, %v63_v28  ;;  %v118_v59 = vor.u32 1.1754944e-38, %v117_v54 }
  0x23   :  { %vm116_vm5 = vcmp.eq.f32.partialorder %v115_v57, 8.507059e+37 }
  0x24   :  { %v75_v42 = vadd.f32 %v74_v34, %v72_v38 }
  0x26   :  { %v688_v37 = vpop.eup %687  ;;  %v79_v45 = vadd.f32 %v78_v39, %v75_v42 }
  0x27   :  { %v107_v44 = vmul.f32 %v688_v37, %v105_v19  ;;  %vm112_vm3 = vweird.f32 %v688_v37 }
  0x28   :  { %v84_v47 = vadd.f32 %v83_v43, %v79_v45  ;;  %vm113_vm4 = vmor %vm111_vm2, %vm112_vm3 }
  0x29   :  { %v108_v48 = vsub.f32 1.0, %v107_v44 }
  0x2a   :  { %v89_v49 = vadd.f32 %v88_v46, %v84_v47 }
  0x2b   :  { %v109_v51 = vmul.f32 %v688_v37, %v108_v48 }
  0x2c   :  { %v90_v50 = vmul.f32 %v89_v49, %v903_v3 }
  0x2d   :  { %v110_v56 = vadd.f32 %v688_v37, %v109_v51 }
  0x2e   :  { %v91_v52 = vsel %vm58_vm1, %v90_v50, 0.0 }
  0x2f   :  { %v92_v53 = vrot.slane %v91_v52, 4  ;;  %v114_v61 = vsel %vm113_vm4, %v688_v37, %v110_v56 }
  0x30   :  { %v119_v63 = vsel %vm116_vm5, %v118_v59, %v114_v61 }
  0x31   :  { %v93_v55 = vadd.f32 %v92_v53, %v91_v52 }
  0x33   :  { %v94_v58 = vrot.slane %v93_v55, 2 }
  0x35   :  { %v95_v60 = vadd.f32 %v94_v58, %v93_v55 }
  0x37   :  { %v96_v62 = vrot.slane %v95_v60, 1 }
  0x39   :  { %v97_v0 = vadd.f32 %v96_v62, %v95_v60 }
  0x3b   :  { %v120_v1 = vmul.f32 %v119_v63, %v97_v0  }
  0x85   :  { %v576_v5 = vpop.xlane.xlu0 %575 }
  0x86   :  { %592 = vpush %v576_v5 }
  0xb7   :  { %s593_s0 = spop %592 }
  0xb8   :  { %p578_p0 = scmp.gt.f32.partialorder %s593_s0, 0.5 }
  0xb9   :  { %s940_s1 = smov (%p578_p0), 0   ;;  %v942_v7 = vmov (%p578_p0), 1.0  }
  0xba   :  { %581 = sbr.rel (!%p578_p0) target bundleno = 1007 (0x3ef), region = 55 }
  0xbf LB: > { %vm135_vm6 = vcmp.gt.f32.partialorder %v845_v7, 0.5  ;;  %v879_v8 = vmov 0.0   ;;  %v1168_v13 = vmov %v853_v4  ;;  %v853_v4 = vphi %v905_v4, %v1179_v4   ;;  %v849_v1 = vphi %v120_v1, %v1178_v1   ;;  %v845_v7 = vphi %v942_v7, %v536_v7   ;;  %s841_s1 = sphi %s940_s1, %s1177_s1  }
  0xc0   : > { %v136_v9 = vsel %vm135_vm6, 999999.0, %v879_v8  }
  0xc1   : > { %v137_v10 = vand.u32 2147483647, %v136_v9 }
  0xc3   : > { %vm138_vm7 = vcmp.gt.f32.partialorder %v137_v10, 1e-06 }
  0xc4   : > { %v139_v11 = vsel %vm138_vm7, 1.0, %v879_v8 }
  0xc5   : > { %140 = vmax.xlane.f32.xlu0 %v139_v11 }
 0x138   : > { %v141_v12 = vpop.xlane.xlu0 %140 }
 0x139   : > { %594 = vpush %v141_v12 }
 0x16a   : > { %s595_s19 = spop %594 }
 0x16b   : > { %p561_p1 = scmp.gt.f32.partialorder %s595_s19, 0.5 }
 0x16c   : > { %s966_s20 = smov (%p561_p1), 0  }
 0x16d   : > { %564 = sbr.rel (!%p561_p1) target bundleno = 776 (0x308), region = 44 }
 0x172 LB: >> { %v156_v14 = vmul.f32 2.0, %v865_v4  ;;  %v158_v15 = vsub.f32 1.0, %v865_v4  ;;  %v985_v42 = vmul.f32 -2.0, %v920_v27  ;;  %s468_s20 = sadd.s32 4, %s857_s20   ;;  %v865_v4 = vphi %v853_v4, %v1175_v4   ;;  %v861_v9 = vphi %v136_v9, %v454_v9   ;;  %s857_s20 = sphi %s966_s20, %s468_s20  }
 0x173   : >> { %p149_p3 = scmp.lt.s32.totalorder %s468_s20, 300 }
 0x174   : >> { %v157_v16 = vsub.f32 1.0, %v156_v14  ;;  %v159_v17 = vmul.f32 %v865_v4, %v158_v15  ;;  %689 = vrcp.f32 %v158_v15  ;;  %vm168_vm8 = vweird.f32 %v158_v15 }
 0x175   : >> { %v172_v25 = vand.u32 2147483647, %v158_v15  ;;  %v174_v28 = vand.u32 2147483648, %v158_v15 }
 0x176   : >> { %691 = vrcp.f32 %v159_v17  ;;  %v160_v18 = vmul.f32 %v157_v16, %v157_v16  ;;  %v198_v23 = vmul.f32 %v159_v17, %v157_v16  ;;  %v204_v33 = vmul.f32 8.0, %v159_v17 }
 0x177   : >> { %v195_v34 = vmul.f32 -6.0, %v157_v16  ;;  %v175_v40 = vor.u32 1.1754944e-38, %v174_v28  ;;  %vm173_vm11 = vcmp.eq.f32.partialorder %v172_v25, 8.507059e+37  ;;  %v191_v57 = vmul.f32 2.0, %v159_v17 }
 0x178   : >> { %v161_v20 = vmul.f32 %v160_v18, %v157_v16  ;;  %v203_v29 = vmul.f32 -10.0, %v160_v18  ;;  %v214_v39 = vmul.f32 24.0, %v198_v23  ;;  %v208_v58 = vmul.f32 %v160_v18, %v159_v17 }
 0x179   : >> { %v196_v48 = vmul.f32 %v924_v31, %v195_v34  ;;  %v199_v60 = vmul.f32 4.0, %v198_v23  ;;  %v192_v0 = vsub.f32 %v160_v18, %v191_v57  ;;  %v187_v6 = vmul.f32 %v920_v27, %v157_v16 }
 0x17a   : >> { %v690_v19 = vpop.eup %689  ;;  %v213_v38 = vmul.f32 -14.0, %v161_v20  ;;  %v205_v45 = vadd.f32 %v204_v33, %v203_v29  ;;  %v162_v62 = vmul.f32 %v161_v20, %v157_v16  ;;  %v209_v2 = vmul.f32 6.0, %v208_v58 }
 0x17b   : >> { %v164_v22 = vmul.f32 %v690_v19, %v158_v15  ;;  %vm169_vm9 = vweird.f32 %v690_v19  ;;  %v200_v10 = vsub.f32 %v161_v20, %v199_v60  ;;  %v193_v12 = vmul.f32 %v924_v31, %v192_v0 }
 0x17c   : >> { %v692_v24 = vpop.eup %691  ;;  %vm170_vm10 = vmor %vm168_vm8, %vm169_vm9  ;;  %v215_v49 = vadd.f32 %v214_v39, %v213_v38  ;;  %v206_v53 = vmul.f32 %v928_v36, %v205_v45  ;;  %v210_v13 = vsub.f32 %v162_v62, %v209_v2 }
 0x17d   : >> { %v165_v30 = vsub.f32 1.0, %v164_v22  ;;  %v183_v32 = vmul.f32 %v692_v24, %v159_v17  ;;  %v201_v17 = vmul.f32 %v928_v36, %v200_v10 }
 0x17e   : >> { %v216_v55 = vmul.f32 %v931_v41, %v215_v49  ;;  %v211_v23 = vmul.f32 %v931_v41, %v210_v13 }
 0x17f   : >> { %v166_v35 = vmul.f32 %v690_v19, %v165_v30  ;;  %v184_v37 = vsub.f32 2.0, %v183_v32  ;;  %v154_v30 = vand.u32 2147483647, %v861_v9 }
 0x181   : >> { %v167_v43 = vadd.f32 %v690_v19, %v166_v35  ;;  %v185_v44 = vmul.f32 %v692_v24, %v184_v37  ;;  %vm1005_vm12 = vcmp.gt.f32.partialorder %v154_v30, 1e-06 }
 0x183   : >> { %v171_v46 = vsel %vm170_vm10, %v690_v19, %v167_v43  ;;  %v186_v47 = vmul.f32 %v918_v26, %v185_v44 }
 0x184   : >> { %v176_v50 = vsel %vm173_vm11, %v175_v40, %v171_v46 }
 0x185   : >> { %v177_v51 = vmul.f32 %v865_v4, %v176_v50  ;;  %v190_v52 = vadd.f32 %v985_v42, %v186_v47 }
 0x187   : >> { %693 = vlog2.f32 %v177_v51  ;;  %v197_v54 = vadd.f32 %v196_v48, %v190_v52 }
 0x189   : >> { %v207_v56 = vadd.f32 %v206_v53, %v197_v54 }
 0x18b   : >> { %v217_v59 = vadd.f32 %v216_v55, %v207_v56 }
 0x18d   : >> { %v694_v61 = vpop.eup %693  ;;  %695 = vrcp.f32 %v217_v59 }
 0x18e   : >> { %v179_v63 = vmul.f32 0.6931472, %v694_v61 }
 0x190   : >> { %v180_v5 = vmul.f32 %v918_v26, %v179_v63 }
 0x192   : >> { %v181_v11 = vadd.f32 %v915_v21, %v180_v5 }
 0x193   : >> { %v696_v14 = vpop.eup %695 }
 0x194   : >> { %v188_v15 = vadd.f32 %v187_v6, %v181_v11  ;;  %v221_v19 = vmul.f32 %v696_v14, %v217_v59 }
 0x196   : >> { %v194_v22 = vadd.f32 %v193_v12, %v188_v15  ;;  %v222_v24 = vsub.f32 2.0, %v221_v19 }
 0x198   : >> { %v202_v18 = vadd.f32 %v201_v17, %v194_v22  ;;  %v223_v16 = vmul.f32 %v696_v14, %v222_v24 }
 0x19a   : >> { %v212_v25 = vadd.f32 %v211_v23, %v202_v18 }
 0x19c   : >> { %v218_v28 = vsub.f32 %v212_v25, %v849_v1 }
 0x19e   : >> { %v219_v20 = vsub.f32 0.0, %v218_v28 }
 0x1a0   : >> { %v1000_v29 = vmul.f32 %v223_v16, %v219_v20 }
 0x1a2   : >> { %v225_v32 = vadd.f32 %v865_v4, %v1000_v29 }
 0x1a4   : >> { %v226_v33 = vmax.f32 %v225_v32, 1e-07 }
 0x1a6   : >> { %v227_v35 = vmin.f32 %v226_v33, 0.9999999 }
 0x1a8   : >> { %v1012_v37 = vsel %vm1005_vm12, %v227_v35, %v865_v4 }
 0x1a9   : >> { %v232_v38 = vmul.f32 2.0, %v1012_v37  ;;  %v234_v39 = vsub.f32 1.0, %v1012_v37 }
 0x1ab   : >> { %v233_v40 = vsub.f32 1.0, %v232_v38  ;;  %v235_v43 = vmul.f32 %v234_v39, %v1012_v37  ;;  %697 = vrcp.f32 %v234_v39  ;;  %vm244_vm13 = vweird.f32 %v234_v39 }
 0x1ac   : >> { %v248_v50 = vand.u32 2147483647, %v234_v39  ;;  %v250_v51 = vand.u32 2147483648, %v234_v39 }
 0x1ad   : >> { %699 = vrcp.f32 %v235_v43  ;;  %v236_v44 = vmul.f32 %v233_v40, %v233_v40  ;;  %v273_v48 = vmul.f32 %v235_v43, %v233_v40  ;;  %v279_v54 = vmul.f32 8.0, %v235_v43 }
 0x1ae   : >> { %v270_v55 = vmul.f32 -6.0, %v233_v40  ;;  %v251_v60 = vor.u32 1.1754944e-38, %v250_v51  ;;  %vm249_vm0 = vcmp.eq.f32.partialorder %v248_v50, 8.507059e+37  ;;  %v266_v19 = vmul.f32 2.0, %v235_v43 }
 0x1af   : >> { %v237_v46 = vmul.f32 %v236_v44, %v233_v40  ;;  %v278_v4 = vmul.f32 -10.0, %v236_v44  ;;  %v289_v59 = vmul.f32 24.0, %v273_v48  ;;  %v283_v22 = vmul.f32 %v236_v44, %v235_v43 }
 0x1b0   : >> { %v271_v5 = vmul.f32 %v924_v31, %v270_v55  ;;  %v274_v18 = vmul.f32 4.0, %v273_v48  ;;  %v267_v16 = vsub.f32 %v236_v44, %v266_v19  ;;  %v263_v32 = vmul.f32 %v920_v27, %v233_v40 }
 0x1b1   : >> { %v698_v45 = vpop.eup %697  ;;  %v288_v58 = vmul.f32 -14.0, %v237_v46  ;;  %v280_v63 = vadd.f32 %v279_v54, %v278_v4  ;;  %v238_v25 = vmul.f32 %v237_v46, %v233_v40  ;;  %v284_v20 = vmul.f32 6.0, %v283_v22 }
 0x1b2   : >> { %v240_v47 = vmul.f32 %v698_v45, %v234_v39  ;;  %vm245_vm14 = vweird.f32 %v698_v45  ;;  %v275_v33 = vsub.f32 %v237_v46, %v274_v18  ;;  %v268_v38 = vmul.f32 %v924_v31, %v267_v16 }
 0x1b3   : >> { %v700_v49 = vpop.eup %699  ;;  %vm246_vm15 = vmor %vm244_vm13, %vm245_vm14  ;;  %v290_v6 = vadd.f32 %v289_v59, %v288_v58  ;;  %v281_v13 = vmul.f32 %v928_v36, %v280_v63  ;;  %v285_v39 = vsub.f32 %v238_v25, %v284_v20  ;;  %v1034_v46 = vsel %vm1005_vm12, %v1000_v29, %v861_v9 }
 0x1b4   : >> { %v241_v52 = vsub.f32 1.0, %v240_v47  ;;  %v259_v53 = vmul.f32 %v700_v49, %v235_v43  ;;  %v276_v47 = vmul.f32 %v928_v36, %v275_v33  ;;  %v230_v55 = vand.u32 2147483647, %v1034_v46 }
 0x1b5   : >> { %v291_v15 = vmul.f32 %v931_v41, %v290_v6  ;;  %v286_v50 = vmul.f32 %v931_v41, %v285_v39 }
 0x1b6   : >> { %v242_v56 = vmul.f32 %v698_v45, %v241_v52  ;;  %v260_v57 = vsub.f32 2.0, %v259_v53  ;;  %vm1041_vm2 = vcmp.gt.f32.partialorder %v230_v55, 1e-06 }
 0x1b8   : >> { %v243_v61 = vadd.f32 %v698_v45, %v242_v56  ;;  %v261_v62 = vmul.f32 %v700_v49, %v260_v57 }
 0x1ba   : >> { %v247_v0 = vsel %vm246_vm15, %v698_v45, %v243_v61  ;;  %v262_v2 = vmul.f32 %v918_v26, %v261_v62 }
 0x1bb   : >> { %v252_v10 = vsel %vm249_vm0, %v251_v60, %v247_v0 }
 0x1bc   : >> { %v253_v11 = vmul.f32 %v252_v10, %v1012_v37  ;;  %v265_v12 = vadd.f32 %v262_v2, %v985_v42 }
 0x1be   : >> { %701 = vlog2.f32 %v253_v11  ;;  %v272_v14 = vadd.f32 %v271_v5, %v265_v12 }
 0x1c0   : >> { %v282_v17 = vadd.f32 %v281_v13, %v272_v14 }
 0x1c2   : >> { %v292_v23 = vadd.f32 %v291_v15, %v282_v17 }
 0x1c4   : >> { %v702_v24 = vpop.eup %701  ;;  %703 = vrcp.f32 %v292_v23 }
 0x1c5   : >> { %v255_v28 = vmul.f32 0.6931472, %v702_v24 }
 0x1c7   : >> { %v256_v30 = vmul.f32 %v918_v26, %v255_v28 }
 0x1c9   : >> { %v257_v35 = vadd.f32 %v915_v21, %v256_v30 }
 0x1ca   : >> { %v704_v45 = vpop.eup %703 }
 0x1cb   : >> { %v264_v43 = vadd.f32 %v263_v32, %v257_v35  ;;  %v296_v48 = vmul.f32 %v704_v45, %v292_v23 }
 0x1cd   : >> { %v269_v49 = vadd.f32 %v268_v38, %v264_v43  ;;  %v297_v51 = vsub.f32 2.0, %v296_v48 }
 0x1cf   : >> { %v277_v44 = vadd.f32 %v276_v47, %v269_v49  ;;  %v298_v40 = vmul.f32 %v704_v45, %v297_v51 }
 0x1d1   : >> { %v287_v4 = vadd.f32 %v286_v50, %v277_v44 }
 0x1d3   : >> { %v293_v52 = vsub.f32 %v287_v4, %v849_v1 }
 0x1d5   : >> { %v294_v53 = vsub.f32 0.0, %v293_v52 }
 0x1d7   : >> { %v1036_v54 = vmul.f32 %v298_v40, %v294_v53 }
 0x1d9   : >> { %v300_v56 = vadd.f32 %v1036_v54, %v1012_v37 }
 0x1db   : >> { %v301_v57 = vmax.f32 %v300_v56, 1e-07 }
 0x1dd   : >> { %v302_v59 = vmin.f32 %v301_v57, 0.9999999 }
 0x1df   : >> { %v1048_v34 = vsel %vm1041_vm2, %v302_v59, %v1012_v37 }
 0x1e0   : >> { %v307_v9 = vmul.f32 2.0, %v1048_v34  ;;  %v309_v29 = vsub.f32 1.0, %v1048_v34 }
 0x1e2   : >> { %v308_v60 = vsub.f32 1.0, %v307_v9  ;;  %v310_v61 = vmul.f32 %v309_v29, %v1048_v34  ;;  %705 = vrcp.f32 %v309_v29  ;;  %vm319_vm3 = vweird.f32 %v309_v29 }
 0x1e3   : >> { %v323_v10 = vand.u32 2147483647, %v309_v29  ;;  %v325_v11 = vand.u32 2147483648, %v309_v29 }
 0x1e4   : >> { %707 = vrcp.f32 %v310_v61  ;;  %v311_v62 = vmul.f32 %v308_v60, %v308_v60  ;;  %v348_v5 = vmul.f32 %v310_v61, %v308_v60  ;;  %v354_v14 = vmul.f32 8.0, %v310_v61 }
 0x1e5   : >> { %v345_v15 = vmul.f32 -6.0, %v308_v60  ;;  %v326_v18 = vor.u32 1.1754944e-38, %v325_v11  ;;  %vm324_vm7 = vcmp.eq.f32.partialorder %v323_v10, 8.507059e+37  ;;  %v341_v48 = vmul.f32 2.0, %v310_v61 }
 0x1e6   : >> { %v312_v0 = vmul.f32 %v311_v62, %v308_v60  ;;  %v353_v37 = vmul.f32 -10.0, %v311_v62  ;;  %v364_v23 = vmul.f32 24.0, %v348_v5  ;;  %v358_v49 = vmul.f32 %v311_v62, %v310_v61 }
 0x1e7   : >> { %v346_v30 = vmul.f32 %v924_v31, %v345_v15  ;;  %v349_v44 = vmul.f32 4.0, %v348_v5  ;;  %v342_v40 = vsub.f32 %v311_v62, %v341_v48  ;;  %v338_v56 = vmul.f32 %v920_v27, %v308_v60 }
 0x1e8   : >> { %v706_v63 = vpop.eup %705  ;;  %v363_v22 = vmul.f32 -14.0, %v312_v0  ;;  %v355_v28 = vadd.f32 %v354_v14, %v353_v37  ;;  %v313_v4 = vmul.f32 %v312_v0, %v308_v60  ;;  %v359_v53 = vmul.f32 6.0, %v358_v49 }
 0x1e9   : >> { %v315_v2 = vmul.f32 %v706_v63, %v309_v29  ;;  %vm320_vm4 = vweird.f32 %v706_v63  ;;  %v350_v57 = vsub.f32 %v312_v0, %v349_v44  ;;  %v343_v9 = vmul.f32 %v924_v31, %v342_v40 }
 0x1ea   : >> { %v708_v6 = vpop.eup %707  ;;  %vm321_vm5 = vmor %vm319_vm3, %vm320_vm4  ;;  %v365_v32 = vadd.f32 %v364_v23, %v363_v22  ;;  %v356_v39 = vmul.f32 %v928_v36, %v355_v28  ;;  %v360_v29 = vsub.f32 %v313_v4, %v359_v53  ;;  %v1070_v0 = vsel %vm1041_vm2, %v1036_v54, %v1034_v46 }
 0x1eb   : >> { %v316_v12 = vsub.f32 1.0, %v315_v2  ;;  %v334_v13 = vmul.f32 %v708_v6, %v310_v61  ;;  %v351_v2 = vmul.f32 %v928_v36, %v350_v57  ;;  %v305_v15 = vand.u32 2147483647, %v1070_v0 }
 0x1ec   : >> { %v366_v43 = vmul.f32 %v931_v41, %v365_v32  ;;  %v361_v10 = vmul.f32 %v931_v41, %v360_v29  ;;  %v880_v22 = vmov 0.0  }
 0x1ed   : >> { %v317_v17 = vmul.f32 %v706_v63, %v316_v12  ;;  %v335_v19 = vsub.f32 2.0, %v334_v13  ;;  %vm1077_vm8 = vcmp.gt.f32.partialorder %v305_v15, 1e-06 }
 0x1ef   : >> { %v318_v24 = vadd.f32 %v706_v63, %v317_v17  ;;  %v336_v25 = vmul.f32 %v708_v6, %v335_v19 }
 0x1f1   : >> { %v322_v16 = vsel %vm321_vm5, %v706_v63, %v318_v24  ;;  %v337_v20 = vmul.f32 %v918_v26, %v336_v25 }
 0x1f2   : >> { %v327_v33 = vsel %vm324_vm7, %v326_v18, %v322_v16 }
 0x1f3   : >> { %v328_v35 = vmul.f32 %v327_v33, %v1048_v34  ;;  %v340_v38 = vadd.f32 %v337_v20, %v985_v42 }
 0x1f5   : >> { %709 = vlog2.f32 %v328_v35  ;;  %v347_v45 = vadd.f32 %v346_v30, %v340_v38 }
 0x1f7   : >> { %v357_v47 = vadd.f32 %v356_v39, %v347_v45 }
 0x1f9   : >> { %v367_v50 = vadd.f32 %v366_v43, %v357_v47 }
 0x1fb   : >> { %v710_v51 = vpop.eup %709  ;;  %711 = vrcp.f32 %v367_v50 }
 0x1fc   : >> { %v330_v52 = vmul.f32 0.6931472, %v710_v51 }
 0x1fe   : >> { %v331_v55 = vmul.f32 %v918_v26, %v330_v52 }
 0x200   : >> { %v332_v59 = vadd.f32 %v915_v21, %v331_v55 }
 0x201   : >> { %v712_v63 = vpop.eup %711 }
 0x202   : >> { %v339_v61 = vadd.f32 %v338_v56, %v332_v59  ;;  %v371_v5 = vmul.f32 %v712_v63, %v367_v50 }
 0x204   : >> { %v344_v6 = vadd.f32 %v343_v9, %v339_v61  ;;  %v372_v11 = vsub.f32 2.0, %v371_v5 }
 0x206   : >> { %v352_v62 = vadd.f32 %v351_v2, %v344_v6  ;;  %v373_v60 = vmul.f32 %v712_v63, %v372_v11 }
 0x208   : >> { %v362_v37 = vadd.f32 %v361_v10, %v352_v62 }
 0x20a   : >> { %v368_v12 = vsub.f32 %v362_v37, %v849_v1 }
 0x20c   : >> { %v369_v13 = vsub.f32 0.0, %v368_v12 }
 0x20e   : >> { %v1072_v14 = vmul.f32 %v373_v60, %v369_v13 }
 0x210   : >> { %v375_v17 = vadd.f32 %v1072_v14, %v1048_v34 }
 0x212   : >> { %v376_v19 = vmax.f32 %v375_v17, 1e-07 }
 0x214   : >> { %v377_v23 = vmin.f32 %v376_v19, 0.9999999 }
 0x216   : >> { %v1084_v58 = vsel %vm1077_vm8, %v377_v23, %v1048_v34 }
 0x217   : >> { %v382_v46 = vmul.f32 2.0, %v1084_v58  ;;  %v384_v54 = vsub.f32 1.0, %v1084_v58 }
 0x219   : >> { %v383_v18 = vsub.f32 1.0, %v382_v46  ;;  %v385_v24 = vmul.f32 %v384_v54, %v1084_v58  ;;  %713 = vrcp.f32 %v384_v54  ;;  %vm394_vm9 = vweird.f32 %v384_v54 }
 0x21a   : >> { %v398_v33 = vand.u32 2147483647, %v384_v54  ;;  %v400_v35 = vand.u32 2147483648, %v384_v54 }
 0x21b   : >> { %715 = vrcp.f32 %v385_v24  ;;  %v386_v25 = vmul.f32 %v383_v18, %v383_v18  ;;  %v423_v30 = vmul.f32 %v385_v24, %v383_v18  ;;  %v429_v45 = vmul.f32 8.0, %v385_v24 }
 0x21c   : >> { %v420_v43 = vmul.f32 -6.0, %v383_v18  ;;  %v401_v44 = vor.u32 1.1754944e-38, %v400_v35  ;;  %vm399_vm12 = vcmp.eq.f32.partialorder %v398_v33, 8.507059e+37  ;;  %v416_v5 = vmul.f32 2.0, %v385_v24 }
 0x21d   : >> { %v387_v16 = vmul.f32 %v386_v25, %v383_v18  ;;  %v428_v34 = vmul.f32 -10.0, %v386_v25  ;;  %v439_v50 = vmul.f32 24.0, %v423_v30  ;;  %v433_v6 = vmul.f32 %v386_v25, %v385_v24 }
 0x21e   : >> { %v421_v55 = vmul.f32 %v924_v31, %v420_v43  ;;  %v424_v62 = vmul.f32 4.0, %v423_v30  ;;  %v417_v60 = vsub.f32 %v386_v25, %v416_v5  ;;  %v379_v25 = vsel %vm1077_vm8, %v1072_v14, %v1070_v0 }
 0x21f   : >> { %v714_v28 = vpop.eup %713  ;;  %v438_v49 = vmul.f32 -14.0, %v387_v16  ;;  %v430_v52 = vadd.f32 %v429_v45, %v428_v34  ;;  %v388_v37 = vmul.f32 %v387_v16, %v383_v18  ;;  %v434_v13 = vmul.f32 6.0, %v433_v6 }
 0x220   : >> { %v390_v20 = vmul.f32 %v714_v28, %v384_v54  ;;  %vm395_vm10 = vweird.f32 %v714_v28  ;;  %v425_v17 = vsub.f32 %v387_v16, %v424_v62  ;;  %v418_v23 = vmul.f32 %v924_v31, %v417_v60 }
 0x221   : >> { %v716_v32 = vpop.eup %715  ;;  %vm396_vm11 = vmor %vm394_vm9, %vm395_vm10  ;;  %v440_v56 = vadd.f32 %v439_v50, %v438_v49  ;;  %v431_v29 = vmul.f32 %v928_v36, %v430_v52  ;;  %v435_v46 = vsub.f32 %v388_v37, %v434_v13  ;;  %v380_v35 = vand.u32 2147483647, %v379_v25 }
 0x222   : >> { %v391_v38 = vsub.f32 1.0, %v390_v20  ;;  %v409_v39 = vmul.f32 %v716_v32, %v385_v24 }
 0x223   : >> { %v441_v61 = vmul.f32 %v931_v41, %v440_v56  ;;  %vm381_vm13 = vcmp.gt.f32.partialorder %v380_v35, 1e-06 }
 0x224   : >> { %v392_v47 = vmul.f32 %v714_v28, %v391_v38  ;;  %v410_v48 = vsub.f32 2.0, %v409_v39 }
 0x226   : >> { %v393_v51 = vadd.f32 %v714_v28, %v392_v47  ;;  %v411_v4 = vmul.f32 %v716_v32, %v410_v48  ;;  %v436_v32 = vmul.f32 %v931_v41, %v435_v46 }
 0x228   : >> { %v397_v40 = vsel %vm396_vm11, %v714_v28, %v393_v51  ;;  %v412_v53 = vmul.f32 %v918_v26, %v411_v4  ;;  %v426_v28 = vmul.f32 %v928_v36, %v425_v17 }
 0x229   : >> { %v402_v57 = vsel %vm399_vm12, %v401_v44, %v397_v40 }
 0x22a   : >> { %v403_v59 = vmul.f32 %v402_v57, %v1084_v58  ;;  %v415_v9 = vadd.f32 %v412_v53, %v985_v42  ;;  %v413_v42 = vmul.f32 %v920_v27, %v383_v18 }
 0x22c   : >> { %717 = vlog2.f32 %v403_v59  ;;  %v422_v63 = vadd.f32 %v421_v55, %v415_v9 }
 0x22e   : >> { %v432_v2 = vadd.f32 %v431_v29, %v422_v63 }
 0x230   : >> { %v442_v10 = vadd.f32 %v441_v61, %v432_v2 }
 0x232   : >> { %v718_v11 = vpop.eup %717  ;;  %719 = vrcp.f32 %v442_v10 }
 0x233   : >> { %v405_v12 = vmul.f32 0.6931472, %v718_v11 }
 0x235   : >> { %v406_v15 = vmul.f32 %v918_v26, %v405_v12 }
 0x237   : >> { %v407_v19 = vadd.f32 %v915_v21, %v406_v15 }
 0x238   : >> { %v720_v54 = vpop.eup %719 }
 0x239   : >> { %v414_v24 = vadd.f32 %v413_v42, %v407_v19  ;;  %v446_v20 = vmul.f32 %v720_v54, %v442_v10 }
 0x23b   : >> { %v419_v30 = vadd.f32 %v418_v23, %v414_v24  ;;  %v447_v16 = vsub.f32 2.0, %v446_v20 }
 0x23d   : >> { %v427_v18 = vadd.f32 %v426_v28, %v419_v30  ;;  %v448_v38 = vmul.f32 %v720_v54, %v447_v16 }
 0x23f   : >> { %v437_v33 = vadd.f32 %v436_v32, %v427_v18 }
 0x241   : >> { %v443_v34 = vsub.f32 %v437_v33, %v849_v1 }
 0x243   : >> { %v444_v39 = vsub.f32 0.0, %v443_v34 }
 0x245   : >> { %v449_v45 = vmul.f32 %v448_v38, %v444_v39 }
 0x247   : >> { %v450_v43 = vadd.f32 %v449_v45, %v1084_v58  ;;  %v454_v9 = vsel %vm381_vm13, %v449_v45, %v379_v25  }
 0x248   : >> { %v455_v47 = vand.u32 2147483647, %v454_v9 }
 0x249   : >> { %v451_v48 = vmax.f32 %v450_v43, 1e-07 }
 0x24a   : >> { %vm456_vm14 = vcmp.gt.f32.partialorder %v455_v47, 1e-06 }
 0x24b   : >> { %v452_v49 = vmin.f32 %v451_v48, 0.9999999  ;;  %v457_v0 = vsel %vm456_vm14, 1.0, %v880_v22 }
 0x24c   : >> { %v458_v14 = vsel %vm58_vm1, %v457_v0, -inf }
 0x24d   : >> { %v453_v50 = vsel %vm381_vm13, %v452_v49, %v1084_v58   ;;  %459 = vmax.xlane.f32.xlu0 %v458_v14 }
 0x2c0   : >> { %v460_v44 = vpop.xlane.xlu0 %459 }
 0x2c1   : >> { %v461_v51 = vrot.slane %v460_v44, 4 }
 0x2c3   : >> { %v462_v4 = vmax.f32 %v460_v44, %v461_v51 }
 0x2c5   : >> { %v463_v52 = vrot.slane %v462_v4, 2 }
 0x2c7   : >> { %v464_v40 = vmax.f32 %v462_v4, %v463_v52  ;;  %v1175_v4 = vmov %v453_v50 }
 0x2c9   : >> { %v465_v53 = vrot.slane %v464_v40, 1 }
 0x2cb   : >> { %v466_v55 = vmax.f32 %v464_v40, %v465_v53 }
 0x2cd   : >> { %596 = vpush %v466_v55 }
 0x2fe   : >> { %s597_s21 = spop %596 }
 0x2ff   : >> { %p148_p2 = scmp.gt.f32.partialorder %s597_s21, 0.5 }
 0x301   : >> { %p150_p4 = pnand %p149_p3, %p148_p2 }
 0x302   : > { %v1176_v13 = vmov (%p150_p4), %v453_v50 }
 0x303   : > { %153 = sbr.rel (!%p150_p4) target bundleno = 370 (0x172), region = 50 }
 0x308 PF: > { %v471_v58 = vsub.f32 1.0, %v869_v13  ;;  %v509_v56 = vmul.f32 %v869_v13, %v903_v3  ;;  %s537_s22 = sadd.s32 1, %s841_s1   ;;  %v469_v61 = vmul.f32 2.0, %v869_v13  ;;  %v479_v19 = vmul.f32 %v869_v13, %v915_v21  ;;  %v869_v13 = vphi %v1168_v13, %v1176_v13  }
 0x309   : > { %p130_p5 = scmp.lt.s32.totalorder %s537_s22, 300  ;;  %s1177_s1 = smov %s537_s22 }
 0x30a   : > { %v474_v57 = vrot.slane %v471_v58, 6  ;;  %v510_v59 = vsel %vm58_vm1, %v509_v56, 0.0  ;;  %v470_v6 = vsub.f32 1.0, %v469_v61  ;;  %v472_v12 = vmul.f32 %v869_v13, %v471_v58 }
 0x30b   : > { %v511_v29 = vrot.slane %v510_v59, 4 }
 0x30c   : > { %v476_v9 = vsel %vm58_vm1, %v869_v13, %v474_v57  ;;  %v493_v42 = vmul.f32 %v470_v6, %v470_v6  ;;  %v490_v46 = vmul.f32 %v472_v12, %v470_v6  ;;  %v488_v28 = vmul.f32 %v920_v27, %v472_v12 }
 0x30d   : > { %721 = vlog2.f32 %v476_v9  ;;  %v512_v63 = vadd.f32 %v511_v29, %v510_v59 }
 0x30e   : > { %v497_v54 = vmul.f32 %v493_v42, %v470_v6  ;;  %v494_v20 = vmul.f32 %v493_v42, %v472_v12  ;;  %v491_v25 = vmul.f32 %v924_v31, %v490_v46 }
 0x30f   : > { %v513_v2 = vrot.slane %v512_v63, 2 }
 0x310   : > { %v498_v18 = vmul.f32 %v497_v54, %v472_v12  ;;  %v495_v33 = vmul.f32 %v928_v36, %v494_v20 }
 0x311   : > { %v514_v5 = vadd.f32 %v513_v2, %v512_v63 }
 0x312   : > { %v499_v38 = vmul.f32 %v931_v41, %v498_v18 }
 0x313   : > { %v722_v10 = vpop.eup %721  ;;  %v515_v62 = vrot.slane %v514_v5, 1 }
 0x314   : > { %v478_v11 = vmul.f32 0.6931472, %v722_v10 }
 0x315   : > { %v516_v37 = vadd.f32 %v515_v62, %v514_v5 }
 0x316   : > { %v480_v60 = vmul.f32 %v869_v13, %v478_v11  ;;  %v482_v15 = vrot.slane %v478_v11, 2 }
 0x317   : > { %723 = vrcp.f32 %v516_v37  ;;  %vm522_vm15 = vweird.f32 %v516_v37  ;;  %v528_v0 = vand.u32 2147483648, %v516_v37  ;;  %v526_v44 = vand.u32 2147483647, %v516_v37 }
 0x318   : > { %v484_v17 = vmul.f32 %v482_v15, %v471_v58 }
 0x319   : > { %v529_v4 = vor.u32 1.1754944e-38, %v528_v0  ;;  %vm527_vm3 = vcmp.eq.f32.partialorder %v526_v44, 8.507059e+37 }
 0x31a   : > { %v485_v23 = vadd.f32 %v484_v17, %v480_v60 }
 0x31c   : > { %v486_v24 = vmul.f32 %v918_v26, %v485_v23 }
 0x31d   : > { %v724_v30 = vpop.eup %723 }
 0x31e   : > { %v487_v32 = vadd.f32 %v486_v24, %v479_v19  ;;  %v518_v35 = vmul.f32 %v724_v30, %v516_v37  ;;  %vm523_vm0 = vweird.f32 %v724_v30 }
 0x31f   : > { %vm524_vm2 = vmor %vm522_vm15, %vm523_vm0 }
 0x320   : > { %v489_v16 = vadd.f32 %v488_v28, %v487_v32  ;;  %v519_v45 = vsub.f32 1.0, %v518_v35 }
 0x322   : > { %v492_v34 = vadd.f32 %v491_v25, %v489_v16  ;;  %v520_v48 = vmul.f32 %v724_v30, %v519_v45 }
 0x324   : > { %v496_v39 = vadd.f32 %v495_v33, %v492_v34  ;;  %v521_v50 = vadd.f32 %v724_v30, %v520_v48 }
 0x326   : > { %v500_v43 = vadd.f32 %v499_v38, %v496_v39  ;;  %v525_v40 = vsel %vm524_vm2, %v724_v30, %v521_v50 }
 0x327   : > { %v530_v55 = vsel %vm527_vm3, %v529_v4, %v525_v40  ;;  %v1179_v4 = vmov %v869_v13 }
 0x328   : > { %v501_v47 = vmul.f32 %v500_v43, %v903_v3 }
 0x32a   : > { %v502_v49 = vsel %vm58_vm1, %v501_v47, 0.0 }
 0x32b   : > { %v503_v22 = vrot.slane %v502_v49, 4 }
 0x32d   : > { %v504_v14 = vadd.f32 %v503_v22, %v502_v49 }
 0x32f   : > { %v505_v51 = vrot.slane %v504_v14, 2 }
 0x331   : > { %v506_v52 = vadd.f32 %v505_v51, %v504_v14 }
 0x333   : > { %v507_v53 = vrot.slane %v506_v52, 1 }
 0x335   : > { %v508_v58 = vadd.f32 %v507_v53, %v506_v52 }
 0x337   : > { %v531_v56 = vmul.f32 %v530_v55, %v508_v58  }
 0x339   : > { %v532_v57 = vsub.f32 %v531_v56, %v849_v1  ;;  %v1178_v1 = vmov %v531_v56 }
 0x33b   : > { %v533_v59 = vand.u32 2147483647, %v532_v57 }
 0x33d   : > { %vm534_vm4 = vcmp.gt.f32.partialorder %v533_v59, 0.0001 }
 0x33e   : > { %vm535_vm5 = vmand %vm135_vm6, %vm534_vm4 }
 0x33f   : > { %v536_v7 = vsel %vm535_vm5, 1.0, %v879_v8  }
 0x340   : > { %126 = vmax.xlane.f32.xlu0 %v536_v7 }
 0x3b3   : > { %v127_v29 = vpop.xlane.xlu0 %126 }
 0x3b4   : > { %598 = vpush %v127_v29 }
 0x3e5   : > { %s599_s23 = spop %598 }
 0x3e6   : > { %p129_p6 = scmp.gt.f32.partialorder %s599_s23, 0.5 }
 0x3e8   : > { %p131_p7 = pnand %p130_p5, %p129_p6 }
 0x3e9   :  { %v1180_v6 = vmov (%p131_p7), %v869_v13 }
 0x3ea   :  { %134 = sbr.rel (!%p131_p7) target bundleno = 191 (0xbf), region = 61 }
 0x3ef PF:  { %538 = vst [vmem:[#allocation7] sm:$0x3] %v873_v6  ;;  %s546_s26 = sshll.u32 %s1166_s2, 4  ;;  %s881_s27 = smov [#allocation7]   ;;  %v873_v6 = vphi %v1167_v6, %v1180_v6   ;;  %s547_s26 = int_to_ptr.hbm [resolvable:$true] %s546_s26 }
 0x3f0   :  { %s544_s28 = sshll.u32 %s881_s27, 4  ;;  %s545_s28 = int_to_ptr.vmem [resolvable:$true] %s544_s28 }
 0x3f1   :  { %549 = dma.vmem_to_hbm [thread:$0]  %s545_s28, 32, %s547_s26, [#allocation4]  }
 0x3f2   :  { %837 = dma.done.wait [#allocation4], 32  }
 0x3f3   :  { %838 = vsyncadd [#allocation4], 4294967264 }
 0x3f4   :  { %554 = vsyncpa [#allocation3], 1 }
 0x3f5   :  { %555 = vsyncpa [#allocation6], 1 }
 0x3f6   :  { %556 = vsyncpa [#allocation4], 1 }

</bundles_post_ra>
